<compile_context>
chip_gen: v7x
topology: tpu7x:2x2x1
jax: 0.10.0
libtpu: 0.0.40
codegen_flags: <defaults>
</compile_context>

<pallas_src>
import functools

import jax
import jax.numpy as jnp
from jax import lax
from jax.experimental import pallas as pl
from jax.experimental.pallas import tpu as pltpu


_LANE = 128                       # lane width: keep lane dims multiples of this
_ACT_DTYPE = jnp.bfloat16         # activation / MXU-operand dtype (accum stays f32)
_GEMM_VMEM_LIMIT = 32 * 1024 * 1024
_TAP_VMEM_LIMIT = 48 * 1024 * 1024
_TAP_VMEM_BUDGET = 30 * 1024 * 1024   # estimated footprint above which we fall back


def _round_up(x, m):
    return (x + m - 1) // m * m


# ----------------------------- Pallas kernels ------------------------------


def _gemm_bias_kernel(a_ref, b_ref, bias_ref, o_ref, *, relu):
    acc = jnp.dot(a_ref[...], b_ref[...], preferred_element_type=jnp.float32)
    acc = acc + bias_ref[...]
    if relu:
        acc = jnp.maximum(acc, 0.0)
    o_ref[...] = acc.astype(o_ref.dtype)


def _gemm_bias_res_kernel(a_ref, b_ref, bias_ref, res_ref, o_ref, *, relu):
    # Matches the PyTorch Block: relu(conv(...)) first (ReLU lives inside the
    # sequential `model`), then the skip branch is added.
    acc = jnp.dot(a_ref[...], b_ref[...], preferred_element_type=jnp.float32)
    acc = acc + bias_ref[...]
    if relu:
        acc = jnp.maximum(acc, 0.0)
    o_ref[...] = (acc + res_ref[...].astype(jnp.float32)).astype(o_ref.dtype)


def _conv_tap_kernel(x_ref, w_ref, b_ref, o_ref, acc_ref, *,
                     tap_offsets, rows_out, relu):
    # x_ref: (r_in, Cin) bf16 -- zero-padded image, flattened spatially.
    # w_ref: (KH*KW, Cin, Coutp) bf16.  b_ref: (1, Coutp) f32.
    # o_ref: (rows_out, Coutp).  acc_ref: VMEM (rows_out, Coutp) f32.
    for t, off in enumerate(tap_offsets):
        lhs = x_ref[off:off + rows_out, :]
        prod = jnp.dot(lhs, w_ref[t], preferred_element_type=jnp.float32)
        if t == 0:
            acc_ref[...] = prod
        else:
            acc_ref[...] += prod
    acc = acc_ref[...] + b_ref[...]
    if relu:
        acc = jnp.maximum(acc, 0.0)
    o_ref[...] = acc.astype(o_ref.dtype)


def _conv_tap_res_kernel(x_ref, w_ref, b_ref, res_ref, o_ref, acc_ref, *,
                         tap_offsets, rows_out, relu):
    for t, off in enumerate(tap_offsets):
        lhs = x_ref[off:off + rows_out, :]
        prod = jnp.dot(lhs, w_ref[t], preferred_element_type=jnp.float32)
        if t == 0:
            acc_ref[...] = prod
        else:
            acc_ref[...] += prod
    acc = acc_ref[...] + b_ref[...]
    if relu:
        acc = jnp.maximum(acc, 0.0)
    acc = acc + res_ref[...].astype(jnp.float32)
    o_ref[...] = acc.astype(o_ref.dtype)


def _head_kernel(x_ref, w_ref, b_ref, o_ref, acc_ref, *, inv_hw):
    # Global average pool streamed over spatial tiles, accumulated in VMEM,
    # then 1x1 conv (== matmul over channels) + bias on the last grid step.
    s = pl.program_id(0)

    @pl.when(s == 0)
    def _():
        acc_ref[...] = jnp.zeros_like(acc_ref)

    acc_ref[...] += jnp.sum(x_ref[...].astype(jnp.float32), axis=1)   # (N, C)

    @pl.when(s == pl.num_programs(0) - 1)
    def _():
        pooled = acc_ref[...] * inv_hw                                # (N, C)
        out = jnp.dot(pooled, w_ref[...], preferred_element_type=jnp.float32)
        o_ref[...] = (out + b_ref[...]).astype(o_ref.dtype)


# ----------------------------- Pallas wrappers ------------------------------


def _pallas_gemm(patches, w_mat, bias, *, relu, residual=None,
                 out_dtype=_ACT_DTYPE, tm_target=1024):
    """(M,K) @ (K,N) + bias [+ residual], optional fused ReLU.

    Tiled over M ("parallel", double-buffered).  K and the 128-padded N stay
    whole per tile.  Operands / residual bf16, accumulation + epilogue f32,
    output dtype selectable (bf16 for intermediate activations).
    """
    M, K = patches.shape
    Kw, N = w_mat.shape
    assert K == Kw
    n_pad = max(_LANE, _round_up(N, _LANE))

    # M tiling: single tile for small M; otherwise >= 2 grid steps (so both
    # v7x TensorCores get work), capped at tm_target.  bf16 tiles at tm=1024
    # keep the footprint well under v5e's 16 MiB scoped-VMEM default too.
    if M <= 512:
        tm = _round_up(max(M, 8), 16)
        m_pad = tm
    else:
        tm = min(tm_target, _round_up(-(-M // 2), _LANE))
        m_pad = _round_up(M, tm)

    a = patches.astype(_ACT_DTYPE)
    if m_pad != M:
        a = jnp.pad(a, ((0, m_pad - M), (0, 0)))
    b = w_mat.astype(_ACT_DTYPE)
    bias2d = bias.reshape(1, N).astype(jnp.float32)
    if n_pad != N:
        b = jnp.pad(b, ((0, 0), (0, n_pad - N)))
        bias2d = jnp.pad(bias2d, ((0, 0), (0, n_pad - N)))

    in_specs = [
        pl.BlockSpec((tm, K), lambda i: (i, 0)),
        pl.BlockSpec((K, n_pad), lambda i: (0, 0)),
        pl.BlockSpec((1, n_pad), lambda i: (0, 0)),
    ]
    args = [a, b, bias2d]
    bytes_accessed = a.size * 2 + b.size * 2 + bias2d.size * 4 + m_pad * n_pad * 2

    if residual is None:
        kernel = functools.partial(_gemm_bias_kernel, relu=relu)
    else:
        kernel = functools.partial(_gemm_bias_res_kernel, relu=relu)
        res = residual.astype(_ACT_DTYPE)          # bf16 DMA; add stays f32 in-kernel
        if m_pad != M or n_pad != N:
            res = jnp.pad(res, ((0, m_pad - M), (0, n_pad - N)))
        in_specs.append(pl.BlockSpec((tm, n_pad), lambda i: (i, 0)))
        args.append(res)
        bytes_accessed += res.size * 2

    out = pl.pallas_call(
        kernel,
        out_shape=jax.ShapeDtypeStruct((m_pad, n_pad), out_dtype),
        grid=(m_pad // tm,),
        in_specs=in_specs,
        out_specs=pl.BlockSpec((tm, n_pad), lambda i: (i, 0)),
        compiler_params=pltpu.CompilerParams(
            dimension_semantics=("parallel",),
            vmem_limit_bytes=_GEMM_VMEM_LIMIT),
        cost_estimate=pl.CostEstimate(
            flops=2 * m_pad * K * n_pad,
            transcendentals=0,
            bytes_accessed=int(bytes_accessed)),
    )(*args)
    return out[:M, :N]


def _conv_tap(x_nhwc, w, bias, *, relu, residual=None):
    """Stride-1, 'same'-padded KxK conv via in-kernel tap accumulation.

    The padded activation lives in VMEM as one flattened (r_in, Cin) block per
    image; each of the KH*KW taps is a statically-offset row window of that
    block fed to the MXU, accumulated in an f32 scratch.  Bias / ReLU /
    skip-add are fused in the epilogue.  Returns None if the per-image
    footprint exceeds the VMEM budget (caller falls back to im2col + GEMM).
    """
    N, H, W, Cin = x_nhwc.shape
    KH, KW, Cin_w, Cout = w.shape
    assert Cin == Cin_w and KH % 2 == 1 and KW % 2 == 1
    ph, pw = (KH - 1) // 2, (KW - 1) // 2
    Hout, Wout = H, W
    Hp, Wp = H + KH - 1, W + KW - 1
    coutp = max(_LANE, _round_up(Cout, _LANE))
    rows_out = _round_up(Hout * Wp, 8)
    max_off = (KH - 1) * Wp + (KW - 1)
    r_in = _round_up(max_off + rows_out, 8)

    # Per-image VMEM footprint (double-buffered in/out + f32 accumulator).
    vmem_bytes = (2 * (r_in * Cin * 2 + KH * KW * Cin * coutp * 2 + coutp * 4)
                  + 2 * rows_out * coutp * 2
                  + rows_out * coutp * 4)
    if residual is not None:
        vmem_bytes += 2 * rows_out * coutp * 2
    if vmem_bytes > _TAP_VMEM_BUDGET:
        return None

    xp = jnp.pad(x_nhwc.astype(_ACT_DTYPE),
                 ((0, 0), (ph, ph), (pw, pw), (0, 0)))
    x_flat = xp.reshape(N, Hp * Wp, Cin)
    if r_in != Hp * Wp:
        x_flat = jnp.pad(x_flat, ((0, 0), (0, r_in - Hp * Wp), (0, 0)))

    w_taps = w.reshape(KH * KW, Cin, Cout).astype(_ACT_DTYPE)
    bias2d = bias.reshape(1, Cout).astype(jnp.float32)
    if coutp != Cout:
        w_taps = jnp.pad(w_taps, ((0, 0), (0, 0), (0, coutp - Cout)))
        bias2d = jnp.pad(bias2d, ((0, 0), (0, coutp - Cout)))

    tap_offsets = tuple(ki * Wp + kj for ki in range(KH) for kj in range(KW))

    in_specs = [
        pl.BlockSpec((None, r_in, Cin), lambda n: (n, 0, 0)),
        pl.BlockSpec((KH * KW, Cin, coutp), lambda n: (0, 0, 0)),
        pl.BlockSpec((1, coutp), lambda n: (0, 0)),
    ]
    args = [x_flat, w_taps, bias2d]
    bytes_accessed = (x_flat.size * 2 + w_taps.size * 2 + bias2d.size * 4
                      + N * rows_out * coutp * 2)

    if residual is None:
        kernel = functools.partial(_conv_tap_kernel, tap_offsets=tap_offsets,
                                   rows_out=rows_out, relu=relu)
    else:
        kernel = functools.partial(_conv_tap_res_kernel, tap_offsets=tap_offsets,
                                   rows_out=rows_out, relu=relu)
        res = residual.astype(_ACT_DTYPE)                       # (N, Hout, Wout, Cout)
        res = jnp.pad(res, ((0, 0), (0, 0), (0, Wp - Wout), (0, coutp - Cout)))
        res = res.reshape(N, Hout * Wp, coutp)
        if rows_out != Hout * Wp:
            res = jnp.pad(res, ((0, 0), (0, rows_out - Hout * Wp), (0, 0)))
        in_specs.append(pl.BlockSpec((None, rows_out, coutp), lambda n: (n, 0, 0)))
        args.append(res)
        bytes_accessed += res.size * 2

    out = pl.pallas_call(
        kernel,
        out_shape=jax.ShapeDtypeStruct((N, rows_out, coutp), _ACT_DTYPE),
        grid=(N,),
        in_specs=in_specs,
        out_specs=pl.BlockSpec((None, rows_out, coutp), lambda n: (n, 0, 0)),
        scratch_shapes=[pltpu.VMEM((rows_out, coutp), jnp.float32)],
        compiler_params=pltpu.CompilerParams(
            dimension_semantics=("parallel",),
            vmem_limit_bytes=_TAP_VMEM_LIMIT),
        cost_estimate=pl.CostEstimate(
            flops=2 * N * rows_out * KH * KW * Cin * coutp,
            transcendentals=0,
            bytes_accessed=int(bytes_accessed)),
    )(*args)

    # (N, rows_out, coutp) padded-width layout -> (N, Hout, Wout, Cout).
    out = out[:, :Hout * Wp, :].reshape(N, Hout, Wp, coutp)
    return out[:, :, :Wout, :Cout]


def _pallas_head(x_nhwc, w, bias, *, ts_target=2048):
    """AdaptiveAvgPool2d((1,1)) + Conv2d(C, ncls, k=1) + Flatten."""
    N, H, W, C = x_nhwc.shape
    Cc, ncls = w.shape
    assert Cc == C
    HW = H * W
    ncls_pad = max(_LANE, _round_up(ncls, _LANE))

    x = x_nhwc.astype(_ACT_DTYPE).reshape(N, HW, C)     # bf16 reads halve head traffic
    if HW <= ts_target:
        ts = _round_up(HW, 8)
        hw_pad = ts
    else:
        ts = ts_target
        hw_pad = _round_up(HW, ts)
    if hw_pad != HW:
        # Zero rows contribute nothing to the channel sums; we divide by the
        # true HW inside the kernel.
        x = jnp.pad(x, ((0, 0), (0, hw_pad - HW), (0, 0)))

    w_p = w.astype(jnp.float32)
    b_p = bias.reshape(1, ncls).astype(jnp.float32)
    if ncls_pad != ncls:
        w_p = jnp.pad(w_p, ((0, 0), (0, ncls_pad - ncls)))
        b_p = jnp.pad(b_p, ((0, 0), (0, ncls_pad - ncls)))

    out = pl.pallas_call(
        functools.partial(_head_kernel, inv_hw=1.0 / float(HW)),
        out_shape=jax.ShapeDtypeStruct((N, ncls_pad), jnp.float32),
        grid=(hw_pad // ts,),
        in_specs=[
            pl.BlockSpec((N, ts, C), lambda s: (0, s, 0)),
            pl.BlockSpec((C, ncls_pad), lambda s: (0, 0)),
            pl.BlockSpec((1, ncls_pad), lambda s: (0, 0)),
        ],
        out_specs=pl.BlockSpec((N, ncls_pad), lambda s: (0, 0)),
        scratch_shapes=[pltpu.VMEM((N, C), jnp.float32)],
        compiler_params=pltpu.CompilerParams(
            dimension_semantics=("arbitrary",),
            vmem_limit_bytes=_GEMM_VMEM_LIMIT),
        cost_estimate=pl.CostEstimate(
            flops=N * hw_pad * C + 2 * N * C * ncls_pad,
            transcendentals=0,
            bytes_accessed=int(x.size * 2 + w_p.size * 4 + b_p.size * 4
                               + N * ncls_pad * 4)),
    )(x, w_p, b_p)
    return out[:, :ncls]


# ------------------------------ conv dispatch --------------------------------


def _im2col(x_nhwc, kh, kw, stride, pad, *, k_pad_to=None):
    N, H, W, C = x_nhwc.shape
    xp = jnp.pad(x_nhwc, ((0, 0), (pad, pad), (pad, pad), (0, 0)))
    Hout = (H + 2 * pad - kh) // stride + 1
    Wout = (W + 2 * pad - kw) // stride + 1
    cols = []
    for i in range(kh):
        for j in range(kw):
            cols.append(
                xp[:, i:i + stride * Hout:stride, j:j + stride * Wout:stride, :])
    K = kh * kw * C
    if k_pad_to is not None and k_pad_to > K:
        # Append lane-padding zeros inside the concatenate (no extra pad pass).
        cols.append(jnp.zeros((N, Hout, Wout, k_pad_to - K), x_nhwc.dtype))
        K = k_pad_to
    patches = jnp.concatenate(cols, axis=-1)          # (N, Hout, Wout, K)
    return patches.reshape(N * Hout * Wout, K), Hout, Wout


def conv2d(x_nhwc, w, b, *, stride, pad, relu, residual=None):
    """Conv2d with fused bias/ReLU[/residual].  w: (KH, KW, Cin, Cout)."""
    kh, kw, cin, cout = w.shape
    if stride == 1 and kh == kw and pad == (kh - 1) // 2:
        out = _conv_tap(x_nhwc, w, b, relu=relu, residual=residual)
        if out is not None:
            return out
    # Fallback / strided path: im2col (bf16) + fused GEMM.
    N = x_nhwc.shape[0]
    K = kh * kw * cin
    k_pad = _round_up(K, _LANE) if K > _LANE else K
    patches, Hout, Wout = _im2col(x_nhwc.astype(_ACT_DTYPE), kh, kw, stride, pad,
                                  k_pad_to=k_pad)
    w_mat = w.reshape(K, cout)
    if k_pad != K:
        w_mat = jnp.pad(w_mat, ((0, k_pad - K), (0, 0)))
    res = None if residual is None else residual.reshape(N * Hout * Wout, cout)
    out = _pallas_gemm(patches, w_mat, b, relu=relu, residual=res)
    return out.reshape(N, Hout, Wout, cout)


def _skip_conv(x_nhwc, w, b):
    """1x1 conv, stride 2, no pad: strided subsample + plain fused GEMM."""
    xs = x_nhwc[:, ::2, ::2, :]
    N, Hs, Ws, Cin = xs.shape
    cout = w.shape[-1]
    out = _pallas_gemm(xs.reshape(N * Hs * Ws, Cin), w.reshape(Cin, cout), b,
                       relu=False)
    return out.reshape(N, Hs, Ws, cout)


def _stem_conv(x_nhwc, w, b):
    # TODO(synk): the 11x11 / stride-2 / Cin=3 stem is lowered via XLA's native
    # convolution per perf review (an im2col patch matrix would be ~30x the
    # input in HBM); bias + ReLU fuse into the same XLA pass.
    y = lax.conv_general_dilated(
        x_nhwc.astype(_ACT_DTYPE), w.astype(_ACT_DTYPE),
        window_strides=(2, 2), padding=((5, 5), (5, 5)),
        dimension_numbers=("NHWC", "HWIO", "NHWC"),
        preferred_element_type=jnp.float32)
    y = jnp.maximum(y + b.astype(jnp.float32), 0.0)
    return y.astype(_ACT_DTYPE)


# --------------------------- model definition -------------------------------


def init_params(key, in_channels=3, num_classes=104):
    channels_l0 = 64
    c1 = channels_l0
    c2 = c1 * 2
    ks = jax.random.split(key, 12)

    def conv_init(kh_, kw_, cin, cout, k_w, k_b):
        fan_in = kh_ * kw_ * cin
        scale = 1.0 / jnp.sqrt(jnp.float32(fan_in))
        w = jax.random.normal(k_w, (kh_, kw_, cin, cout), jnp.float32) * scale
        b = jax.random.normal(k_b, (cout,), jnp.float32) * scale
        return w, b

    p = {}
    p["w0"], p["b0"] = conv_init(11, 11, in_channels, channels_l0, ks[0], ks[1])
    p["w1"], p["b1"] = conv_init(3, 3, c1, c2, ks[2], ks[3])        # block conv1 (stride 2)
    p["w2"], p["b2"] = conv_init(3, 3, c2, c2, ks[4], ks[5])        # block conv2
    p["w3"], p["b3"] = conv_init(3, 3, c2, c2, ks[6], ks[7])        # block conv3
    p["wskip"], p["bskip"] = conv_init(1, 1, c1, c2, ks[8], ks[9])  # skip 1x1 (stride 2)
    # classifier 1x1 conv: (num_classes, c2, 1, 1) in torch -> (c2, num_classes)
    scale = 1.0 / jnp.sqrt(jnp.float32(c2))
    p["wc"] = jax.random.normal(ks[10], (c2, num_classes), jnp.float32) * scale
    p["bc"] = jax.random.normal(ks[11], (num_classes,), jnp.float32) * scale
    return p


def petals_to_metals_forward(x_nchw, params):
    # NCHW (torch) -> NHWC (kernel layout)
    x = jnp.transpose(x_nchw, (0, 2, 3, 1)).astype(jnp.float32)

    # Conv2d(in, 64, k=11, s=2, p=5) + ReLU (XLA native conv per perf review)
    x = _stem_conv(x, params["w0"], params["b0"])

    # Block(64 -> 128, stride=2): relu(conv3(relu(conv2(relu(conv1(x)))))) + skip(x)
    skip = _skip_conv(x, params["wskip"], params["bskip"])
    h = conv2d(x, params["w1"], params["b1"], stride=2, pad=1, relu=True)
    h = conv2d(h, params["w2"], params["b2"], stride=1, pad=1, relu=True)
    h = conv2d(h, params["w3"], params["b3"], stride=1, pad=1, relu=True,
               residual=skip)

    # AdaptiveAvgPool2d((1,1)) -> Dropout(eval identity) -> Conv2d(128, ncls, k=1) -> Flatten
    logits = _pallas_head(h, params["wc"], params["bc"])
    return logits                                              # (N, num_classes)


def _reference_forward(x_nchw, params):
    """Pure-JAX f32 reference (for a tolerance check against the bf16 kernels)."""
    x = jnp.transpose(x_nchw, (0, 2, 3, 1)).astype(jnp.float32)

    def conv(x, w, b, stride, pad):
        y = lax.conv_general_dilated(
            x, w.astype(jnp.float32), (stride, stride), ((pad, pad), (pad, pad)),
            dimension_numbers=("NHWC", "HWIO", "NHWC"))
        return y + b.astype(jnp.float32)

    x = jnp.maximum(conv(x, params["w0"], params["b0"], 2, 5), 0.0)
    skip = conv(x, params["wskip"], params["bskip"], 2, 0)
    h = jnp.maximum(conv(x, params["w1"], params["b1"], 2, 1), 0.0)
    h = jnp.maximum(conv(h, params["w2"], params["b2"], 1, 1), 0.0)
    h = jnp.maximum(conv(h, params["w3"], params["b3"], 1, 1), 0.0)
    h = h + skip
    pooled = jnp.mean(h, axis=(1, 2))
    return pooled @ params["wc"] + params["bc"]


if __name__ == "__main__":
    key = jax.random.PRNGKey(0)
    k_params, k_x = jax.random.split(key)
    params = init_params(k_params, in_channels=3, num_classes=104)

    # Small example input consistent with the module: batch=2, C=3, 16x16.
    x = jax.random.normal(k_x, (2, 3, 16, 16), jnp.float32)

    fwd = jax.jit(petals_to_metals_forward)
    out = fwd(x, params)
    jax.block_until_ready(out)
    assert out.shape == (2, 104), out.shape
    assert out.dtype == jnp.float32

    # Tolerance check against a pure-JAX f32 reference (bf16 activations -> small drift).
    ref = jax.jit(_reference_forward)(x, params)
    jax.block_until_ready(ref)
    err = float(jnp.max(jnp.abs(out - ref)))
    assert err < 0.15, f"max abs error vs f32 reference too large: {err}"
    print("KERNEL_OK")
</pallas_src>

<mosaic_0001>
module attributes {stable_mosaic.version = 11 : i64} {
  func.func @_gemm_bias_kernel(%arg0: i32, %arg1: memref<32x640xbf16, #tpu.memory_space<vmem>>, %arg2: memref<640x128xbf16, #tpu.memory_space<vmem>>, %arg3: memref<1x128xf32, #tpu.memory_space<vmem>>, %arg4: memref<32x128xbf16, #tpu.memory_space<vmem>>) attributes {dimension_semantics = [#tpu.dimension_semantics<parallel>], iteration_bounds = array<i64: 1>, scalar_prefetch = 0 : i64, scratch_operands = 0 : i64, tpu.core_type = #tpu.core_type<tc>, window_params = [{transform_indices = @transform_0, window_bounds = array<i64: 32, 640>}, {pipeline_mode = #tpu.pipeline_mode<synchronous>, transform_indices = @transform_1, window_bounds = array<i64: 640, 128>}, {pipeline_mode = #tpu.pipeline_mode<synchronous>, transform_indices = @transform_2, window_bounds = array<i64: 1, 128>}, {transform_indices = @transform_3, window_bounds = array<i64: 32, 128>}]} {
    %c0 = arith.constant 0 : index
    %c0_0 = arith.constant 0 : index
    %0 = vector.load %arg1[%c0, %c0_0] : memref<32x640xbf16, #tpu.memory_space<vmem>>, vector<32x640xbf16>
    %c0_1 = arith.constant 0 : index
    %c0_2 = arith.constant 0 : index
    %1 = vector.load %arg2[%c0_1, %c0_2] : memref<640x128xbf16, #tpu.memory_space<vmem>>, vector<640x128xbf16>
    %cst = arith.constant dense<0.000000e+00> : vector<32x128xf32>
    %2 = tpu.matmul %0, %1, %cst {dimension_numbers = #tpu.dot_dimension_numbers<[1], [0], [0], [1], [0, 0, 1, 1], [], []>} : vector<32x640xbf16>, vector<640x128xbf16>, vector<32x128xf32> -> vector<32x128xf32>
    %c0_3 = arith.constant 0 : index
    %c0_4 = arith.constant 0 : index
    %3 = vector.load %arg3[%c0_3, %c0_4] : memref<1x128xf32, #tpu.memory_space<vmem>>, vector<1x128xf32>
    %4 = vector.broadcast %3 : vector<1x128xf32> to vector<32x128xf32>
    %5 = arith.addf %2, %4 : vector<32x128xf32>
    %cst_5 = arith.constant 0.000000e+00 : f32
    %6 = vector.broadcast %cst_5 : f32 to vector<32x128xf32>
    %7 = arith.maximumf %5, %6 : vector<32x128xf32>
    %8 = arith.truncf %7 : vector<32x128xf32> to vector<32x128xbf16>
    %c0_6 = arith.constant 0 : index
    %c0_7 = arith.constant 0 : index
    %9 = vector.load %arg4[%c0_6, %c0_7] : memref<32x128xbf16, #tpu.memory_space<vmem>>, vector<32x128xbf16>
    tpu.vector_store %arg4[%c0_6, %c0_7], %8 {strides = array<i32>} : memref<32x128xbf16, #tpu.memory_space<vmem>>, vector<32x128xbf16>,
    return
  }
  func.func @transform_0(%arg0: i32) -> (i32, i32) {
    %c0_i32 = arith.constant 0 : i32
    %c0_i32_0 = arith.constant 0 : i32
    return %arg0, %c0_i32 : i32, i32
  }
  func.func @transform_1(%arg0: i32) -> (i32, i32) {
    %c0_i32 = arith.constant 0 : i32
    %c0_i32_0 = arith.constant 0 : i32
    %c0_i32_1 = arith.constant 0 : i32
    return %c0_i32, %c0_i32_0 : i32, i32
  }
  func.func @transform_2(%arg0: i32) -> (i32, i32) {
    %c0_i32 = arith.constant 0 : i32
    %c0_i32_0 = arith.constant 0 : i32
    %c0_i32_1 = arith.constant 0 : i32
    return %c0_i32, %c0_i32_0 : i32, i32
  }
  func.func @transform_3(%arg0: i32) -> (i32, i32) {
    %c0_i32 = arith.constant 0 : i32
    %c0_i32_0 = arith.constant 0 : i32
    return %arg0, %c0_i32 : i32, i32
  }
}

module attributes {stable_mosaic.version = 11 : i64} {
  func.func @_conv_tap_kernel(%arg0: i32, %arg1: memref<1x40x128xbf16, #tpu.memory_space<vmem>>, %arg2: memref<9x128x128xbf16, #tpu.memory_space<vmem>>, %arg3: memref<1x128xf32, #tpu.memory_space<vmem>>, %arg4: memref<1x24x128xbf16, #tpu.memory_space<vmem>>, %arg5: memref<24x128xf32, #tpu.memory_space<vmem>>) attributes {dimension_semantics = [#tpu.dimension_semantics<parallel>], iteration_bounds = array<i64: 2>, scalar_prefetch = 0 : i64, scratch_operands = 1 : i64, tpu.core_type = #tpu.core_type<tc>, window_params = [{transform_indices = @transform_0, window_bounds = array<i64: 1, 40, 128>}, {pipeline_mode = #tpu.pipeline_mode<synchronous>, transform_indices = @transform_1, window_bounds = array<i64: 9, 128, 128>}, {pipeline_mode = #tpu.pipeline_mode<synchronous>, transform_indices = @transform_2, window_bounds = array<i64: 1, 128>}, {transform_indices = @transform_3, window_bounds = array<i64: 1, 24, 128>}]} {
    %c0 = arith.constant 0 : index
    %c0_0 = arith.constant 0 : index
    %c0_1 = arith.constant 0 : index
    %0 = vector.load %arg1[%c0, %c0_0, %c0_1] : memref<1x40x128xbf16, #tpu.memory_space<vmem>>, vector<1x24x128xbf16>
    %1 = vector.shape_cast %0 : vector<1x24x128xbf16> to vector<24x128xbf16>
    %c0_2 = arith.constant 0 : index
    %c0_3 = arith.constant 0 : index
    %c0_4 = arith.constant 0 : index
    %2 = vector.load %arg2[%c0_2, %c0_3, %c0_4] : memref<9x128x128xbf16, #tpu.memory_space<vmem>>, vector<1x128x128xbf16>
    %3 = vector.shape_cast %2 : vector<1x128x128xbf16> to vector<128x128xbf16>
    %cst = arith.constant dense<0.000000e+00> : vector<24x128xf32>
    %4 = tpu.matmul %1, %3, %cst {dimension_numbers = #tpu.dot_dimension_numbers<[1], [0], [0], [1], [0, 0, 1, 1], [], []>} : vector<24x128xbf16>, vector<128x128xbf16>, vector<24x128xf32> -> vector<24x128xf32>
    %c0_5 = arith.constant 0 : index
    %c0_6 = arith.constant 0 : index
    %5 = vector.load %arg5[%c0_5, %c0_6] : memref<24x128xf32, #tpu.memory_space<vmem>>, vector<24x128xf32>
    tpu.vector_store %arg5[%c0_5, %c0_6], %4 {strides = array<i32>} : memref<24x128xf32, #tpu.memory_space<vmem>>, vector<24x128xf32>,
    %c0_7 = arith.constant 0 : index
    %c1 = arith.constant 1 : index
    %c0_8 = arith.constant 0 : index
    %6 = vector.load %arg1[%c0_7, %c1, %c0_8] : memref<1x40x128xbf16, #tpu.memory_space<vmem>>, vector<1x24x128xbf16>
    %7 = vector.shape_cast %6 : vector<1x24x128xbf16> to vector<24x128xbf16>
    %c1_9 = arith.constant 1 : index
    %c0_10 = arith.constant 0 : index
    %c0_11 = arith.constant 0 : index
    %8 = vector.load %arg2[%c1_9, %c0_10, %c0_11] : memref<9x128x128xbf16, #tpu.memory_space<vmem>>, vector<1x128x128xbf16>
    %9 = vector.shape_cast %8 : vector<1x128x128xbf16> to vector<128x128xbf16>
    %cst_12 = arith.constant dense<0.000000e+00> : vector<24x128xf32>
    %10 = tpu.matmul %7, %9, %cst_12 {dimension_numbers = #tpu.dot_dimension_numbers<[1], [0], [0], [1], [0, 0, 1, 1], [], []>} : vector<24x128xbf16>, vector<128x128xbf16>, vector<24x128xf32> -> vector<24x128xf32>
    %c0_13 = arith.constant 0 : index
    %c0_14 = arith.constant 0 : index
    %11 = vector.load %arg5[%c0_13, %c0_14] : memref<24x128xf32, #tpu.memory_space<vmem>>, vector<24x128xf32>
    %12 = arith.addf %11, %10 : vector<24x128xf32>
    %c0_15 = arith.constant 0 : index
    %c0_16 = arith.constant 0 : index
    %13 = vector.load %arg5[%c0_15, %c0_16] : memref<24x128xf32, #tpu.memory_space<vmem>>, vector<24x128xf32>
    tpu.vector_store %arg5[%c0_15, %c0_16], %12 {strides = array<i32>} : memref<24x128xf32, #tpu.memory_space<vmem>>, vector<24x128xf32>,
    %c0_17 = arith.constant 0 : index
    %c2 = arith.constant 2 : index
    %c0_18 = arith.constant 0 : index
    %14 = vector.load %arg1[%c0_17, %c2, %c0_18] : memref<1x40x128xbf16, #tpu.memory_space<vmem>>, vector<1x24x128xbf16>
    %15 = vector.shape_cast %14 : vector<1x24x128xbf16> to vector<24x128xbf16>
    %c2_19 = arith.constant 2 : index
    %c0_20 = arith.constant 0 : index
    %c0_21 = arith.constant 0 : index
    %16 = vector.load %arg2[%c2_19, %c0_20, %c0_21] : memref<9x128x128xbf16, #tpu.memory_space<vmem>>, vector<1x128x128xbf16>
    %17 = vector.shape_cast %16 : vector<1x128x128xbf16> to vector<128x128xbf16>
    %cst_22 = arith.constant dense<0.000000e+00> : vector<24x128xf32>
    %18 = tpu.matmul %15, %17, %cst_22 {dimension_numbers = #tpu.dot_dimension_numbers<[1], [0], [0], [1], [0, 0, 1, 1], [], []>} : vector<24x128xbf16>, vector<128x128xbf16>, vector<24x128xf32> -> vector<24x128xf32>
    %c0_23 = arith.constant 0 : index
    %c0_24 = arith.constant 0 : index
    %19 = vector.load %arg5[%c0_23, %c0_24] : memref<24x128xf32, #tpu.memory_space<vmem>>, vector<24x128xf32>
    %20 = arith.addf %19, %18 : vector<24x128xf32>
    %c0_25 = arith.constant 0 : index
    %c0_26 = arith.constant 0 : index
    %21 = vector.load %arg5[%c0_25, %c0_26] : memref<24x128xf32, #tpu.memory_space<vmem>>, vector<24x128xf32>
    tpu.vector_store %arg5[%c0_25, %c0_26], %20 {strides = array<i32>} : memref<24x128xf32, #tpu.memory_space<vmem>>, vector<24x128xf32>,
    %c0_27 = arith.constant 0 : index
    %c6 = arith.constant 6 : index
    %c0_28 = arith.constant 0 : index
    %22 = vector.load %arg1[%c0_27, %c6, %c0_28] : memref<1x40x128xbf16, #tpu.memory_space<vmem>>, vector<1x24x128xbf16>
    %23 = vector.shape_cast %22 : vector<1x24x128xbf16> to vector<24x128xbf16>
    %c3 = arith.constant 3 : index
    %c0_29 = arith.constant 0 : index
    %c0_30 = arith.constant 0 : index
    %24 = vector.load %arg2[%c3, %c0_29, %c0_30] : memref<9x128x128xbf16, #tpu.memory_space<vmem>>, vector<1x128x128xbf16>
    %25 = vector.shape_cast %24 : vector<1x128x128xbf16> to vector<128x128xbf16>
    %cst_31 = arith.constant dense<0.000000e+00> : vector<24x128xf32>
    %26 = tpu.matmul %23, %25, %cst_31 {dimension_numbers = #tpu.dot_dimension_numbers<[1], [0], [0], [1], [0, 0, 1, 1], [], []>} : vector<24x128xbf16>, vector<128x128xbf16>, vector<24x128xf32> -> vector<24x128xf32>
    %c0_32 = arith.constant 0 : index
    %c0_33 = arith.constant 0 : index
    %27 = vector.load %arg5[%c0_32, %c0_33] : memref<24x128xf32, #tpu.memory_space<vmem>>, vector<24x128xf32>
    %28 = arith.addf %27, %26 : vector<24x128xf32>
    %c0_34 = arith.constant 0 : index
    %c0_35 = arith.constant 0 : index
    %29 = vector.load %arg5[%c0_34, %c0_35] : memref<24x128xf32, #tpu.memory_space<vmem>>, vector<24x128xf32>
    tpu.vector_store %arg5[%c0_34, %c0_35], %28 {strides = array<i32>} : memref<24x128xf32, #tpu.memory_space<vmem>>, vector<24x128xf32>,
    %c0_36 = arith.constant 0 : index
    %c7 = arith.constant 7 : index
    %c0_37 = arith.constant 0 : index
    %30 = vector.load %arg1[%c0_36, %c7, %c0_37] : memref<1x40x128xbf16, #tpu.memory_space<vmem>>, vector<1x24x128xbf16>
    %31 = vector.shape_cast %30 : vector<1x24x128xbf16> to vector<24x128xbf16>
    %c4 = arith.constant 4 : index
    %c0_38 = arith.constant 0 : index
    %c0_39 = arith.constant 0 : index
    %32 = vector.load %arg2[%c4, %c0_38, %c0_39] : memref<9x128x128xbf16, #tpu.memory_space<vmem>>, vector<1x128x128xbf16>
    %33 = vector.shape_cast %32 : vector<1x128x128xbf16> to vector<128x128xbf16>
    %cst_40 = arith.constant dense<0.000000e+00> : vector<24x128xf32>
    %34 = tpu.matmul %31, %33, %cst_40 {dimension_numbers = #tpu.dot_dimension_numbers<[1], [0], [0], [1], [0, 0, 1, 1], [], []>} : vector<24x128xbf16>, vector<128x128xbf16>, vector<24x128xf32> -> vector<24x128xf32>
    %c0_41 = arith.constant 0 : index
    %c0_42 = arith.constant 0 : index
    %35 = vector.load %arg5[%c0_41, %c0_42] : memref<24x128xf32, #tpu.memory_space<vmem>>, vector<24x128xf32>
    %36 = arith.addf %35, %34 : vector<24x128xf32>
    %c0_43 = arith.constant 0 : index
    %c0_44 = arith.constant 0 : index
    %37 = vector.load %arg5[%c0_43, %c0_44] : memref<24x128xf32, #tpu.memory_space<vmem>>, vector<24x128xf32>
    tpu.vector_store %arg5[%c0_43, %c0_44], %36 {strides = array<i32>} : memref<24x128xf32, #tpu.memory_space<vmem>>, vector<24x128xf32>,
    %c0_45 = arith.constant 0 : index
    %c8 = arith.constant 8 : index
    %c0_46 = arith.constant 0 : index
    %38 = vector.load %arg1[%c0_45, %c8, %c0_46] : memref<1x40x128xbf16, #tpu.memory_space<vmem>>, vector<1x24x128xbf16>
    %39 = vector.shape_cast %38 : vector<1x24x128xbf16> to vector<24x128xbf16>
    %c5 = arith.constant 5 : index
    %c0_47 = arith.constant 0 : index
    %c0_48 = arith.constant 0 : index
    %40 = vector.load %arg2[%c5, %c0_47, %c0_48] : memref<9x128x128xbf16, #tpu.memory_space<vmem>>, vector<1x128x128xbf16>
    %41 = vector.shape_cast %40 : vector<1x128x128xbf16> to vector<128x128xbf16>
    %cst_49 = arith.constant dense<0.000000e+00> : vector<24x128xf32>
    %42 = tpu.matmul %39, %41, %cst_49 {dimension_numbers = #tpu.dot_dimension_numbers<[1], [0], [0], [1], [0, 0, 1, 1], [], []>} : vector<24x128xbf16>, vector<128x128xbf16>, vector<24x128xf32> -> vector<24x128xf32>
    %c0_50 = arith.constant 0 : index
    %c0_51 = arith.constant 0 : index
    %43 = vector.load %arg5[%c0_50, %c0_51] : memref<24x128xf32, #tpu.memory_space<vmem>>, vector<24x128xf32>
    %44 = arith.addf %43, %42 : vector<24x128xf32>
    %c0_52 = arith.constant 0 : index
    %c0_53 = arith.constant 0 : index
    %45 = vector.load %arg5[%c0_52, %c0_53] : memref<24x128xf32, #tpu.memory_space<vmem>>, vector<24x128xf32>
    tpu.vector_store %arg5[%c0_52, %c0_53], %44 {strides = array<i32>} : memref<24x128xf32, #tpu.memory_space<vmem>>, vector<24x128xf32>,
    %c0_54 = arith.constant 0 : index
    %c12 = arith.constant 12 : index
    %c0_55 = arith.constant 0 : index
    %46 = vector.load %arg1[%c0_54, %c12, %c0_55] : memref<1x40x128xbf16, #tpu.memory_space<vmem>>, vector<1x24x128xbf16>
    %47 = vector.shape_cast %46 : vector<1x24x128xbf16> to vector<24x128xbf16>
    %c6_56 = arith.constant 6 : index
    %c0_57 = arith.constant 0 : index
    %c0_58 = arith.constant 0 : index
    %48 = vector.load %arg2[%c6_56, %c0_57, %c0_58] : memref<9x128x128xbf16, #tpu.memory_space<vmem>>, vector<1x128x128xbf16>
    %49 = vector.shape_cast %48 : vector<1x128x128xbf16> to vector<128x128xbf16>
    %cst_59 = arith.constant dense<0.000000e+00> : vector<24x128xf32>
    %50 = tpu.matmul %47, %49, %cst_59 {dimension_numbers = #tpu.dot_dimension_numbers<[1], [0], [0], [1], [0, 0, 1, 1], [], []>} : vector<24x128xbf16>, vector<128x128xbf16>, vector<24x128xf32> -> vector<24x128xf32>
    %c0_60 = arith.constant 0 : index
    %c0_61 = arith.constant 0 : index
    %51 = vector.load %arg5[%c0_60, %c0_61] : memref<24x128xf32, #tpu.memory_space<vmem>>, vector<24x128xf32>
    %52 = arith.addf %51, %50 : vector<24x128xf32>
    %c0_62 = arith.constant 0 : index
    %c0_63 = arith.constant 0 : index
    %53 = vector.load %arg5[%c0_62, %c0_63] : memref<24x128xf32, #tpu.memory_space<vmem>>, vector<24x128xf32>
    tpu.vector_store %arg5[%c0_62, %c0_63], %52 {strides = array<i32>} : memref<24x128xf32, #tpu.memory_space<vmem>>, vector<24x128xf32>,
    %c0_64 = arith.constant 0 : index
    %c13 = arith.constant 13 : index
    %c0_65 = arith.constant 0 : index
    %54 = vector.load %arg1[%c0_64, %c13, %c0_65] : memref<1x40x128xbf16, #tpu.memory_space<vmem>>, vector<1x24x128xbf16>
    %55 = vector.shape_cast %54 : vector<1x24x128xbf16> to vector<24x128xbf16>
    %c7_66 = arith.constant 7 : index
    %c0_67 = arith.constant 0 : index
    %c0_68 = arith.constant 0 : index
    %56 = vector.load %arg2[%c7_66, %c0_67, %c0_68] : memref<9x128x128xbf16, #tpu.memory_space<vmem>>, vector<1x128x128xbf16>
    %57 = vector.shape_cast %56 : vector<1x128x128xbf16> to vector<128x128xbf16>
    %cst_69 = arith.constant dense<0.000000e+00> : vector<24x128xf32>
    %58 = tpu.matmul %55, %57, %cst_69 {dimension_numbers = #tpu.dot_dimension_numbers<[1], [0], [0], [1], [0, 0, 1, 1], [], []>} : vector<24x128xbf16>, vector<128x128xbf16>, vector<24x128xf32> -> vector<24x128xf32>
    %c0_70 = arith.constant 0 : index
    %c0_71 = arith.constant 0 : index
    %59 = vector.load %arg5[%c0_70, %c0_71] : memref<24x128xf32, #tpu.memory_space<vmem>>, vector<24x128xf32>
    %60 = arith.addf %59, %58 : vector<24x128xf32>
    %c0_72 = arith.constant 0 : index
    %c0_73 = arith.constant 0 : index
    %61 = vector.load %arg5[%c0_72, %c0_73] : memref<24x128xf32, #tpu.memory_space<vmem>>, vector<24x128xf32>
    tpu.vector_store %arg5[%c0_72, %c0_73], %60 {strides = array<i32>} : memref<24x128xf32, #tpu.memory_space<vmem>>, vector<24x128xf32>,
    %c0_74 = arith.constant 0 : index
    %c14 = arith.constant 14 : index
    %c0_75 = arith.constant 0 : index
    %62 = vector.load %arg1[%c0_74, %c14, %c0_75] : memref<1x40x128xbf16, #tpu.memory_space<vmem>>, vector<1x24x128xbf16>
    %63 = vector.shape_cast %62 : vector<1x24x128xbf16> to vector<24x128xbf16>
    %c8_76 = arith.constant 8 : index
    %c0_77 = arith.constant 0 : index
    %c0_78 = arith.constant 0 : index
    %64 = vector.load %arg2[%c8_76, %c0_77, %c0_78] : memref<9x128x128xbf16, #tpu.memory_space<vmem>>, vector<1x128x128xbf16>
    %65 = vector.shape_cast %64 : vector<1x128x128xbf16> to vector<128x128xbf16>
    %cst_79 = arith.constant dense<0.000000e+00> : vector<24x128xf32>
    %66 = tpu.matmul %63, %65, %cst_79 {dimension_numbers = #tpu.dot_dimension_numbers<[1], [0], [0], [1], [0, 0, 1, 1], [], []>} : vector<24x128xbf16>, vector<128x128xbf16>, vector<24x128xf32> -> vector<24x128xf32>
    %c0_80 = arith.constant 0 : index
    %c0_81 = arith.constant 0 : index
    %67 = vector.load %arg5[%c0_80, %c0_81] : memref<24x128xf32, #tpu.memory_space<vmem>>, vector<24x128xf32>
    %68 = arith.addf %67, %66 : vector<24x128xf32>
    %c0_82 = arith.constant 0 : index
    %c0_83 = arith.constant 0 : index
    %69 = vector.load %arg5[%c0_82, %c0_83] : memref<24x128xf32, #tpu.memory_space<vmem>>, vector<24x128xf32>
    tpu.vector_store %arg5[%c0_82, %c0_83], %68 {strides = array<i32>} : memref<24x128xf32, #tpu.memory_space<vmem>>, vector<24x128xf32>,
    %c0_84 = arith.constant 0 : index
    %c0_85 = arith.constant 0 : index
    %70 = vector.load %arg5[%c0_84, %c0_85] : memref<24x128xf32, #tpu.memory_space<vmem>>, vector<24x128xf32>
    %c0_86 = arith.constant 0 : index
    %c0_87 = arith.constant 0 : index
    %71 = vector.load %arg3[%c0_86, %c0_87] : memref<1x128xf32, #tpu.memory_space<vmem>>, vector<1x128xf32>
    %72 = vector.broadcast %71 : vector<1x128xf32> to vector<24x128xf32>
    %73 = arith.addf %70, %72 : vector<24x128xf32>
    %cst_88 = arith.constant 0.000000e+00 : f32
    %74 = vector.broadcast %cst_88 : f32 to vector<24x128xf32>
    %75 = arith.maximumf %73, %74 : vector<24x128xf32>
    %76 = arith.truncf %75 : vector<24x128xf32> to vector<24x128xbf16>
    %c0_89 = arith.constant 0 : index
    %c0_90 = arith.constant 0 : index
    %c0_91 = arith.constant 0 : index
    %77 = vector.load %arg4[%c0_89, %c0_90, %c0_91] : memref<1x24x128xbf16, #tpu.memory_space<vmem>>, vector<1x24x128xbf16>
    %78 = vector.shape_cast %77 : vector<1x24x128xbf16> to vector<24x128xbf16>
    %79 = vector.shape_cast %76 : vector<24x128xbf16> to vector<1x24x128xbf16>
    tpu.vector_store %arg4[%c0_89, %c0_90, %c0_91], %79 {strides = array<i32>} : memref<1x24x128xbf16, #tpu.memory_space<vmem>>, vector<1x24x128xbf16>,
    return
  }
  func.func @transform_0(%arg0: i32) -> (i32, i32, i32) {
    %c0_i32 = arith.constant 0 : i32
    %c0_i32_0 = arith.constant 0 : i32
    %c0_i32_1 = arith.constant 0 : i32
    return %arg0, %c0_i32, %c0_i32_0 : i32, i32, i32
  }
  func.func @transform_1(%arg0: i32) -> (i32, i32, i32) {
    %c0_i32 = arith.constant 0 : i32
    %c0_i32_0 = arith.constant 0 : i32
    %c0_i32_1 = arith.constant 0 : i32
    %c0_i32_2 = arith.constant 0 : i32
    return %c0_i32, %c0_i32_0, %c0_i32_1 : i32, i32, i32
  }
  func.func @transform_2(%arg0: i32) -> (i32, i32) {
    %c0_i32 = arith.constant 0 : i32
    %c0_i32_0 = arith.constant 0 : i32
    %c0_i32_1 = arith.constant 0 : i32
    return %c0_i32, %c0_i32_0 : i32, i32
  }
  func.func @transform_3(%arg0: i32) -> (i32, i32, i32) {
    %c0_i32 = arith.constant 0 : i32
    %c0_i32_0 = arith.constant 0 : i32
    %c0_i32_1 = arith.constant 0 : i32
    return %arg0, %c0_i32, %c0_i32_0 : i32, i32, i32
  }
}

module attributes {stable_mosaic.version = 11 : i64} {
  func.func @_gemm_bias_kernel(%arg0: i32, %arg1: memref<32x64xbf16, #tpu.memory_space<vmem>>, %arg2: memref<64x128xbf16, #tpu.memory_space<vmem>>, %arg3: memref<1x128xf32, #tpu.memory_space<vmem>>, %arg4: memref<32x128xbf16, #tpu.memory_space<vmem>>) attributes {dimension_semantics = [#tpu.dimension_semantics<parallel>], iteration_bounds = array<i64: 1>, scalar_prefetch = 0 : i64, scratch_operands = 0 : i64, tpu.core_type = #tpu.core_type<tc>, window_params = [{transform_indices = @transform_0, window_bounds = array<i64: 32, 64>}, {pipeline_mode = #tpu.pipeline_mode<synchronous>, transform_indices = @transform_1, window_bounds = array<i64: 64, 128>}, {pipeline_mode = #tpu.pipeline_mode<synchronous>, transform_indices = @transform_2, window_bounds = array<i64: 1, 128>}, {transform_indices = @transform_3, window_bounds = array<i64: 32, 128>}]} {
    %c0 = arith.constant 0 : index
    %c0_0 = arith.constant 0 : index
    %0 = vector.load %arg1[%c0, %c0_0] : memref<32x64xbf16, #tpu.memory_space<vmem>>, vector<32x64xbf16>
    %c0_1 = arith.constant 0 : index
    %c0_2 = arith.constant 0 : index
    %1 = vector.load %arg2[%c0_1, %c0_2] : memref<64x128xbf16, #tpu.memory_space<vmem>>, vector<64x128xbf16>
    %cst = arith.constant dense<0.000000e+00> : vector<32x128xf32>
    %2 = tpu.matmul %0, %1, %cst {dimension_numbers = #tpu.dot_dimension_numbers<[1], [0], [0], [1], [0, 0, 1, 1], [], []>} : vector<32x64xbf16>, vector<64x128xbf16>, vector<32x128xf32> -> vector<32x128xf32>
    %c0_3 = arith.constant 0 : index
    %c0_4 = arith.constant 0 : index
    %3 = vector.load %arg3[%c0_3, %c0_4] : memref<1x128xf32, #tpu.memory_space<vmem>>, vector<1x128xf32>
    %4 = vector.broadcast %3 : vector<1x128xf32> to vector<32x128xf32>
    %5 = arith.addf %2, %4 : vector<32x128xf32>
    %6 = arith.truncf %5 : vector<32x128xf32> to vector<32x128xbf16>
    %c0_5 = arith.constant 0 : index
    %c0_6 = arith.constant 0 : index
    %7 = vector.load %arg4[%c0_5, %c0_6] : memref<32x128xbf16, #tpu.memory_space<vmem>>, vector<32x128xbf16>
    tpu.vector_store %arg4[%c0_5, %c0_6], %6 {strides = array<i32>} : memref<32x128xbf16, #tpu.memory_space<vmem>>, vector<32x128xbf16>,
    return
  }
  func.func @transform_0(%arg0: i32) -> (i32, i32) {
    %c0_i32 = arith.constant 0 : i32
    %c0_i32_0 = arith.constant 0 : i32
    return %arg0, %c0_i32 : i32, i32
  }
  func.func @transform_1(%arg0: i32) -> (i32, i32) {
    %c0_i32 = arith.constant 0 : i32
    %c0_i32_0 = arith.constant 0 : i32
    %c0_i32_1 = arith.constant 0 : i32
    return %c0_i32, %c0_i32_0 : i32, i32
  }
  func.func @transform_2(%arg0: i32) -> (i32, i32) {
    %c0_i32 = arith.constant 0 : i32
    %c0_i32_0 = arith.constant 0 : i32
    %c0_i32_1 = arith.constant 0 : i32
    return %c0_i32, %c0_i32_0 : i32, i32
  }
  func.func @transform_3(%arg0: i32) -> (i32, i32) {
    %c0_i32 = arith.constant 0 : i32
    %c0_i32_0 = arith.constant 0 : i32
    return %arg0, %c0_i32 : i32, i32
  }
}

module attributes {stable_mosaic.version = 11 : i64} {
  func.func @_conv_tap_res_kernel(%arg0: i32, %arg1: memref<1x40x128xbf16, #tpu.memory_space<vmem>>, %arg2: memref<9x128x128xbf16, #tpu.memory_space<vmem>>, %arg3: memref<1x128xf32, #tpu.memory_space<vmem>>, %arg4: memref<1x24x128xbf16, #tpu.memory_space<vmem>>, %arg5: memref<1x24x128xbf16, #tpu.memory_space<vmem>>, %arg6: memref<24x128xf32, #tpu.memory_space<vmem>>) attributes {dimension_semantics = [#tpu.dimension_semantics<parallel>], iteration_bounds = array<i64: 2>, scalar_prefetch = 0 : i64, scratch_operands = 1 : i64, tpu.core_type = #tpu.core_type<tc>, window_params = [{transform_indices = @transform_0, window_bounds = array<i64: 1, 40, 128>}, {pipeline_mode = #tpu.pipeline_mode<synchronous>, transform_indices = @transform_1, window_bounds = array<i64: 9, 128, 128>}, {pipeline_mode = #tpu.pipeline_mode<synchronous>, transform_indices = @transform_2, window_bounds = array<i64: 1, 128>}, {transform_indices = @transform_3, window_bounds = array<i64: 1, 24, 128>}, {transform_indices = @transform_4, window_bounds = array<i64: 1, 24, 128>}]} {
    %c0 = arith.constant 0 : index
    %c0_0 = arith.constant 0 : index
    %c0_1 = arith.constant 0 : index
    %0 = vector.load %arg1[%c0, %c0_0, %c0_1] : memref<1x40x128xbf16, #tpu.memory_space<vmem>>, vector<1x24x128xbf16>
    %1 = vector.shape_cast %0 : vector<1x24x128xbf16> to vector<24x128xbf16>
    %c0_2 = arith.constant 0 : index
    %c0_3 = arith.constant 0 : index
    %c0_4 = arith.constant 0 : index
    %2 = vector.load %arg2[%c0_2, %c0_3, %c0_4] : memref<9x128x128xbf16, #tpu.memory_space<vmem>>, vector<1x128x128xbf16>
    %3 = vector.shape_cast %2 : vector<1x128x128xbf16> to vector<128x128xbf16>
    %cst = arith.constant dense<0.000000e+00> : vector<24x128xf32>
    %4 = tpu.matmul %1, %3, %cst {dimension_numbers = #tpu.dot_dimension_numbers<[1], [0], [0], [1], [0, 0, 1, 1], [], []>} : vector<24x128xbf16>, vector<128x128xbf16>, vector<24x128xf32> -> vector<24x128xf32>
    %c0_5 = arith.constant 0 : index
    %c0_6 = arith.constant 0 : index
    %5 = vector.load %arg6[%c0_5, %c0_6] : memref<24x128xf32, #tpu.memory_space<vmem>>, vector<24x128xf32>
    tpu.vector_store %arg6[%c0_5, %c0_6], %4 {strides = array<i32>} : memref<24x128xf32, #tpu.memory_space<vmem>>, vector<24x128xf32>,
    %c0_7 = arith.constant 0 : index
    %c1 = arith.constant 1 : index
    %c0_8 = arith.constant 0 : index
    %6 = vector.load %arg1[%c0_7, %c1, %c0_8] : memref<1x40x128xbf16, #tpu.memory_space<vmem>>, vector<1x24x128xbf16>
    %7 = vector.shape_cast %6 : vector<1x24x128xbf16> to vector<24x128xbf16>
    %c1_9 = arith.constant 1 : index
    %c0_10 = arith.constant 0 : index
    %c0_11 = arith.constant 0 : index
    %8 = vector.load %arg2[%c1_9, %c0_10, %c0_11] : memref<9x128x128xbf16, #tpu.memory_space<vmem>>, vector<1x128x128xbf16>
    %9 = vector.shape_cast %8 : vector<1x128x128xbf16> to vector<128x128xbf16>
    %cst_12 = arith.constant dense<0.000000e+00> : vector<24x128xf32>
    %10 = tpu.matmul %7, %9, %cst_12 {dimension_numbers = #tpu.dot_dimension_numbers<[1], [0], [0], [1], [0, 0, 1, 1], [], []>} : vector<24x128xbf16>, vector<128x128xbf16>, vector<24x128xf32> -> vector<24x128xf32>
    %c0_13 = arith.constant 0 : index
    %c0_14 = arith.constant 0 : index
    %11 = vector.load %arg6[%c0_13, %c0_14] : memref<24x128xf32, #tpu.memory_space<vmem>>, vector<24x128xf32>
    %12 = arith.addf %11, %10 : vector<24x128xf32>
    %c0_15 = arith.constant 0 : index
    %c0_16 = arith.constant 0 : index
    %13 = vector.load %arg6[%c0_15, %c0_16] : memref<24x128xf32, #tpu.memory_space<vmem>>, vector<24x128xf32>
    tpu.vector_store %arg6[%c0_15, %c0_16], %12 {strides = array<i32>} : memref<24x128xf32, #tpu.memory_space<vmem>>, vector<24x128xf32>,
    %c0_17 = arith.constant 0 : index
    %c2 = arith.constant 2 : index
    %c0_18 = arith.constant 0 : index
    %14 = vector.load %arg1[%c0_17, %c2, %c0_18] : memref<1x40x128xbf16, #tpu.memory_space<vmem>>, vector<1x24x128xbf16>
    %15 = vector.shape_cast %14 : vector<1x24x128xbf16> to vector<24x128xbf16>
    %c2_19 = arith.constant 2 : index
    %c0_20 = arith.constant 0 : index
    %c0_21 = arith.constant 0 : index
    %16 = vector.load %arg2[%c2_19, %c0_20, %c0_21] : memref<9x128x128xbf16, #tpu.memory_space<vmem>>, vector<1x128x128xbf16>
    %17 = vector.shape_cast %16 : vector<1x128x128xbf16> to vector<128x128xbf16>
    %cst_22 = arith.constant dense<0.000000e+00> : vector<24x128xf32>
    %18 = tpu.matmul %15, %17, %cst_22 {dimension_numbers = #tpu.dot_dimension_numbers<[1], [0], [0], [1], [0, 0, 1, 1], [], []>} : vector<24x128xbf16>, vector<128x128xbf16>, vector<24x128xf32> -> vector<24x128xf32>
    %c0_23 = arith.constant 0 : index
    %c0_24 = arith.constant 0 : index
    %19 = vector.load %arg6[%c0_23, %c0_24] : memref<24x128xf32, #tpu.memory_space<vmem>>, vector<24x128xf32>
    %20 = arith.addf %19, %18 : vector<24x128xf32>
    %c0_25 = arith.constant 0 : index
    %c0_26 = arith.constant 0 : index
    %21 = vector.load %arg6[%c0_25, %c0_26] : memref<24x128xf32, #tpu.memory_space<vmem>>, vector<24x128xf32>
    tpu.vector_store %arg6[%c0_25, %c0_26], %20 {strides = array<i32>} : memref<24x128xf32, #tpu.memory_space<vmem>>, vector<24x128xf32>,
    %c0_27 = arith.constant 0 : index
    %c6 = arith.constant 6 : index
    %c0_28 = arith.constant 0 : index
    %22 = vector.load %arg1[%c0_27, %c6, %c0_28] : memref<1x40x128xbf16, #tpu.memory_space<vmem>>, vector<1x24x128xbf16>
    %23 = vector.shape_cast %22 : vector<1x24x128xbf16> to vector<24x128xbf16>
    %c3 = arith.constant 3 : index
    %c0_29 = arith.constant 0 : index
    %c0_30 = arith.constant 0 : index
    %24 = vector.load %arg2[%c3, %c0_29, %c0_30] : memref<9x128x128xbf16, #tpu.memory_space<vmem>>, vector<1x128x128xbf16>
    %25 = vector.shape_cast %24 : vector<1x128x128xbf16> to vector<128x128xbf16>
    %cst_31 = arith.constant dense<0.000000e+00> : vector<24x128xf32>
    %26 = tpu.matmul %23, %25, %cst_31 {dimension_numbers = #tpu.dot_dimension_numbers<[1], [0], [0], [1], [0, 0, 1, 1], [], []>} : vector<24x128xbf16>, vector<128x128xbf16>, vector<24x128xf32> -> vector<24x128xf32>
    %c0_32 = arith.constant 0 : index
    %c0_33 = arith.constant 0 : index
    %27 = vector.load %arg6[%c0_32, %c0_33] : memref<24x128xf32, #tpu.memory_space<vmem>>, vector<24x128xf32>
    %28 = arith.addf %27, %26 : vector<24x128xf32>
    %c0_34 = arith.constant 0 : index
    %c0_35 = arith.constant 0 : index
    %29 = vector.load %arg6[%c0_34, %c0_35] : memref<24x128xf32, #tpu.memory_space<vmem>>, vector<24x128xf32>
    tpu.vector_store %arg6[%c0_34, %c0_35], %28 {strides = array<i32>} : memref<24x128xf32, #tpu.memory_space<vmem>>, vector<24x128xf32>,
    %c0_36 = arith.constant 0 : index
    %c7 = arith.constant 7 : index
    %c0_37 = arith.constant 0 : index
    %30 = vector.load %arg1[%c0_36, %c7, %c0_37] : memref<1x40x128xbf16, #tpu.memory_space<vmem>>, vector<1x24x128xbf16>
    %31 = vector.shape_cast %30 : vector<1x24x128xbf16> to vector<24x128xbf16>
    %c4 = arith.constant 4 : index
    %c0_38 = arith.constant 0 : index
    %c0_39 = arith.constant 0 : index
    %32 = vector.load %arg2[%c4, %c0_38, %c0_39] : memref<9x128x128xbf16, #tpu.memory_space<vmem>>, vector<1x128x128xbf16>
    %33 = vector.shape_cast %32 : vector<1x128x128xbf16> to vector<128x128xbf16>
    %cst_40 = arith.constant dense<0.000000e+00> : vector<24x128xf32>
    %34 = tpu.matmul %31, %33, %cst_40 {dimension_numbers = #tpu.dot_dimension_numbers<[1], [0], [0], [1], [0, 0, 1, 1], [], []>} : vector<24x128xbf16>, vector<128x128xbf16>, vector<24x128xf32> -> vector<24x128xf32>
    %c0_41 = arith.constant 0 : index
    %c0_42 = arith.constant 0 : index
    %35 = vector.load %arg6[%c0_41, %c0_42] : memref<24x128xf32, #tpu.memory_space<vmem>>, vector<24x128xf32>
    %36 = arith.addf %35, %34 : vector<24x128xf32>
    %c0_43 = arith.constant 0 : index
    %c0_44 = arith.constant 0 : index
    %37 = vector.load %arg6[%c0_43, %c0_44] : memref<24x128xf32, #tpu.memory_space<vmem>>, vector<24x128xf32>
    tpu.vector_store %arg6[%c0_43, %c0_44], %36 {strides = array<i32>} : memref<24x128xf32, #tpu.memory_space<vmem>>, vector<24x128xf32>,
    %c0_45 = arith.constant 0 : index
    %c8 = arith.constant 8 : index
    %c0_46 = arith.constant 0 : index
    %38 = vector.load %arg1[%c0_45, %c8, %c0_46] : memref<1x40x128xbf16, #tpu.memory_space<vmem>>, vector<1x24x128xbf16>
    %39 = vector.shape_cast %38 : vector<1x24x128xbf16> to vector<24x128xbf16>
    %c5 = arith.constant 5 : index
    %c0_47 = arith.constant 0 : index
    %c0_48 = arith.constant 0 : index
    %40 = vector.load %arg2[%c5, %c0_47, %c0_48] : memref<9x128x128xbf16, #tpu.memory_space<vmem>>, vector<1x128x128xbf16>
    %41 = vector.shape_cast %40 : vector<1x128x128xbf16> to vector<128x128xbf16>
    %cst_49 = arith.constant dense<0.000000e+00> : vector<24x128xf32>
    %42 = tpu.matmul %39, %41, %cst_49 {dimension_numbers = #tpu.dot_dimension_numbers<[1], [0], [0], [1], [0, 0, 1, 1], [], []>} : vector<24x128xbf16>, vector<128x128xbf16>, vector<24x128xf32> -> vector<24x128xf32>
    %c0_50 = arith.constant 0 : index
    %c0_51 = arith.constant 0 : index
    %43 = vector.load %arg6[%c0_50, %c0_51] : memref<24x128xf32, #tpu.memory_space<vmem>>, vector<24x128xf32>
    %44 = arith.addf %43, %42 : vector<24x128xf32>
    %c0_52 = arith.constant 0 : index
    %c0_53 = arith.constant 0 : index
    %45 = vector.load %arg6[%c0_52, %c0_53] : memref<24x128xf32, #tpu.memory_space<vmem>>, vector<24x128xf32>
    tpu.vector_store %arg6[%c0_52, %c0_53], %44 {strides = array<i32>} : memref<24x128xf32, #tpu.memory_space<vmem>>, vector<24x128xf32>,
    %c0_54 = arith.constant 0 : index
    %c12 = arith.constant 12 : index
    %c0_55 = arith.constant 0 : index
    %46 = vector.load %arg1[%c0_54, %c12, %c0_55] : memref<1x40x128xbf16, #tpu.memory_space<vmem>>, vector<1x24x128xbf16>
    %47 = vector.shape_cast %46 : vector<1x24x128xbf16> to vector<24x128xbf16>
    %c6_56 = arith.constant 6 : index
    %c0_57 = arith.constant 0 : index
    %c0_58 = arith.constant 0 : index
    %48 = vector.load %arg2[%c6_56, %c0_57, %c0_58] : memref<9x128x128xbf16, #tpu.memory_space<vmem>>, vector<1x128x128xbf16>
    %49 = vector.shape_cast %48 : vector<1x128x128xbf16> to vector<128x128xbf16>
    %cst_59 = arith.constant dense<0.000000e+00> : vector<24x128xf32>
    %50 = tpu.matmul %47, %49, %cst_59 {dimension_numbers = #tpu.dot_dimension_numbers<[1], [0], [0], [1], [0, 0, 1, 1], [], []>} : vector<24x128xbf16>, vector<128x128xbf16>, vector<24x128xf32> -> vector<24x128xf32>
    %c0_60 = arith.constant 0 : index
    %c0_61 = arith.constant 0 : index
    %51 = vector.load %arg6[%c0_60, %c0_61] : memref<24x128xf32, #tpu.memory_space<vmem>>, vector<24x128xf32>
    %52 = arith.addf %51, %50 : vector<24x128xf32>
    %c0_62 = arith.constant 0 : index
    %c0_63 = arith.constant 0 : index
    %53 = vector.load %arg6[%c0_62, %c0_63] : memref<24x128xf32, #tpu.memory_space<vmem>>, vector<24x128xf32>
    tpu.vector_store %arg6[%c0_62, %c0_63], %52 {strides = array<i32>} : memref<24x128xf32, #tpu.memory_space<vmem>>, vector<24x128xf32>,
    %c0_64 = arith.constant 0 : index
    %c13 = arith.constant 13 : index
    %c0_65 = arith.constant 0 : index
    %54 = vector.load %arg1[%c0_64, %c13, %c0_65] : memref<1x40x128xbf16, #tpu.memory_space<vmem>>, vector<1x24x128xbf16>
    %55 = vector.shape_cast %54 : vector<1x24x128xbf16> to vector<24x128xbf16>
    %c7_66 = arith.constant 7 : index
    %c0_67 = arith.constant 0 : index
    %c0_68 = arith.constant 0 : index
    %56 = vector.load %arg2[%c7_66, %c0_67, %c0_68] : memref<9x128x128xbf16, #tpu.memory_space<vmem>>, vector<1x128x128xbf16>
    %57 = vector.shape_cast %56 : vector<1x128x128xbf16> to vector<128x128xbf16>
    %cst_69 = arith.constant dense<0.000000e+00> : vector<24x128xf32>
    %58 = tpu.matmul %55, %57, %cst_69 {dimension_numbers = #tpu.dot_dimension_numbers<[1], [0], [0], [1], [0, 0, 1, 1], [], []>} : vector<24x128xbf16>, vector<128x128xbf16>, vector<24x128xf32> -> vector<24x128xf32>
    %c0_70 = arith.constant 0 : index
    %c0_71 = arith.constant 0 : index
    %59 = vector.load %arg6[%c0_70, %c0_71] : memref<24x128xf32, #tpu.memory_space<vmem>>, vector<24x128xf32>
    %60 = arith.addf %59, %58 : vector<24x128xf32>
    %c0_72 = arith.constant 0 : index
    %c0_73 = arith.constant 0 : index
    %61 = vector.load %arg6[%c0_72, %c0_73] : memref<24x128xf32, #tpu.memory_space<vmem>>, vector<24x128xf32>
    tpu.vector_store %arg6[%c0_72, %c0_73], %60 {strides = array<i32>} : memref<24x128xf32, #tpu.memory_space<vmem>>, vector<24x128xf32>,
    %c0_74 = arith.constant 0 : index
    %c14 = arith.constant 14 : index
    %c0_75 = arith.constant 0 : index
    %62 = vector.load %arg1[%c0_74, %c14, %c0_75] : memref<1x40x128xbf16, #tpu.memory_space<vmem>>, vector<1x24x128xbf16>
    %63 = vector.shape_cast %62 : vector<1x24x128xbf16> to vector<24x128xbf16>
    %c8_76 = arith.constant 8 : index
    %c0_77 = arith.constant 0 : index
    %c0_78 = arith.constant 0 : index
    %64 = vector.load %arg2[%c8_76, %c0_77, %c0_78] : memref<9x128x128xbf16, #tpu.memory_space<vmem>>, vector<1x128x128xbf16>
    %65 = vector.shape_cast %64 : vector<1x128x128xbf16> to vector<128x128xbf16>
    %cst_79 = arith.constant dense<0.000000e+00> : vector<24x128xf32>
    %66 = tpu.matmul %63, %65, %cst_79 {dimension_numbers = #tpu.dot_dimension_numbers<[1], [0], [0], [1], [0, 0, 1, 1], [], []>} : vector<24x128xbf16>, vector<128x128xbf16>, vector<24x128xf32> -> vector<24x128xf32>
    %c0_80 = arith.constant 0 : index
    %c0_81 = arith.constant 0 : index
    %67 = vector.load %arg6[%c0_80, %c0_81] : memref<24x128xf32, #tpu.memory_space<vmem>>, vector<24x128xf32>
    %68 = arith.addf %67, %66 : vector<24x128xf32>
    %c0_82 = arith.constant 0 : index
    %c0_83 = arith.constant 0 : index
    %69 = vector.load %arg6[%c0_82, %c0_83] : memref<24x128xf32, #tpu.memory_space<vmem>>, vector<24x128xf32>
    tpu.vector_store %arg6[%c0_82, %c0_83], %68 {strides = array<i32>} : memref<24x128xf32, #tpu.memory_space<vmem>>, vector<24x128xf32>,
    %c0_84 = arith.constant 0 : index
    %c0_85 = arith.constant 0 : index
    %70 = vector.load %arg6[%c0_84, %c0_85] : memref<24x128xf32, #tpu.memory_space<vmem>>, vector<24x128xf32>
    %c0_86 = arith.constant 0 : index
    %c0_87 = arith.constant 0 : index
    %71 = vector.load %arg3[%c0_86, %c0_87] : memref<1x128xf32, #tpu.memory_space<vmem>>, vector<1x128xf32>
    %72 = vector.broadcast %71 : vector<1x128xf32> to vector<24x128xf32>
    %73 = arith.addf %70, %72 : vector<24x128xf32>
    %cst_88 = arith.constant 0.000000e+00 : f32
    %74 = vector.broadcast %cst_88 : f32 to vector<24x128xf32>
    %75 = arith.maximumf %73, %74 : vector<24x128xf32>
    %c0_89 = arith.constant 0 : index
    %c0_90 = arith.constant 0 : index
    %c0_91 = arith.constant 0 : index
    %76 = vector.load %arg4[%c0_89, %c0_90, %c0_91] : memref<1x24x128xbf16, #tpu.memory_space<vmem>>, vector<1x24x128xbf16>
    %77 = vector.shape_cast %76 : vector<1x24x128xbf16> to vector<24x128xbf16>
    %78 = arith.extf %77 : vector<24x128xbf16> to vector<24x128xf32>
    %79 = arith.addf %75, %78 : vector<24x128xf32>
    %80 = arith.truncf %79 : vector<24x128xf32> to vector<24x128xbf16>
    %c0_92 = arith.constant 0 : index
    %c0_93 = arith.constant 0 : index
    %c0_94 = arith.constant 0 : index
    %81 = vector.load %arg5[%c0_92, %c0_93, %c0_94] : memref<1x24x128xbf16, #tpu.memory_space<vmem>>, vector<1x24x128xbf16>
    %82 = vector.shape_cast %81 : vector<1x24x128xbf16> to vector<24x128xbf16>
    %83 = vector.shape_cast %80 : vector<24x128xbf16> to vector<1x24x128xbf16>
    tpu.vector_store %arg5[%c0_92, %c0_93, %c0_94], %83 {strides = array<i32>} : memref<1x24x128xbf16, #tpu.memory_space<vmem>>, vector<1x24x128xbf16>,
    return
  }
  func.func @transform_0(%arg0: i32) -> (i32, i32, i32) {
    %c0_i32 = arith.constant 0 : i32
    %c0_i32_0 = arith.constant 0 : i32
    %c0_i32_1 = arith.constant 0 : i32
    return %arg0, %c0_i32, %c0_i32_0 : i32, i32, i32
  }
  func.func @transform_1(%arg0: i32) -> (i32, i32, i32) {
    %c0_i32 = arith.constant 0 : i32
    %c0_i32_0 = arith.constant 0 : i32
    %c0_i32_1 = arith.constant 0 : i32
    %c0_i32_2 = arith.constant 0 : i32
    return %c0_i32, %c0_i32_0, %c0_i32_1 : i32, i32, i32
  }
  func.func @transform_2(%arg0: i32) -> (i32, i32) {
    %c0_i32 = arith.constant 0 : i32
    %c0_i32_0 = arith.constant 0 : i32
    %c0_i32_1 = arith.constant 0 : i32
    return %c0_i32, %c0_i32_0 : i32, i32
  }
  func.func @transform_3(%arg0: i32) -> (i32, i32, i32) {
    %c0_i32 = arith.constant 0 : i32
    %c0_i32_0 = arith.constant 0 : i32
    %c0_i32_1 = arith.constant 0 : i32
    return %arg0, %c0_i32, %c0_i32_0 : i32, i32, i32
  }
  func.func @transform_4(%arg0: i32) -> (i32, i32, i32) {
    %c0_i32 = arith.constant 0 : i32
    %c0_i32_0 = arith.constant 0 : i32
    %c0_i32_1 = arith.constant 0 : i32
    return %arg0, %c0_i32, %c0_i32_0 : i32, i32, i32
  }
}

module attributes {stable_mosaic.version = 11 : i64} {
  func.func @_head_kernel(%arg0: i32, %arg1: memref<2x16x128xbf16, #tpu.memory_space<vmem>>, %arg2: memref<128x128xf32, #tpu.memory_space<vmem>>, %arg3: memref<1x128xf32, #tpu.memory_space<vmem>>, %arg4: memref<2x128xf32, #tpu.memory_space<vmem>>, %arg5: memref<2x128xf32, #tpu.memory_space<vmem>>) attributes {dimension_semantics = [#tpu.dimension_semantics<arbitrary>], iteration_bounds = array<i64: 1>, scalar_prefetch = 0 : i64, scratch_operands = 1 : i64, tpu.core_type = #tpu.core_type<tc>, window_params = [{transform_indices = @transform_0, window_bounds = array<i64: 2, 16, 128>}, {pipeline_mode = #tpu.pipeline_mode<synchronous>, transform_indices = @transform_1, window_bounds = array<i64: 128, 128>}, {pipeline_mode = #tpu.pipeline_mode<synchronous>, transform_indices = @transform_2, window_bounds = array<i64: 1, 128>}, {pipeline_mode = #tpu.pipeline_mode<synchronous>, transform_indices = @transform_3, window_bounds = array<i64: 2, 128>}]} {
    %c0_i32 = arith.constant 0 : i32
    %0 = arith.cmpi eq, %arg0, %c0_i32 : i32
    %1 = arith.extui %0 : i1 to i32
    %c0_i32_0 = arith.constant 0 : i32
    %2 = arith.cmpi ne, %1, %c0_i32_0 : i32
    scf.if %2 {
      %cst_9 = arith.constant 0.000000e+00 : f32
      %12 = vector.broadcast %cst_9 : f32 to vector<2x128xf32>
      %c0_10 = arith.constant 0 : index
      %c0_11 = arith.constant 0 : index
      %13 = vector.load %arg5[%c0_10, %c0_11] : memref<2x128xf32, #tpu.memory_space<vmem>>, vector<2x128xf32>
      tpu.vector_store %arg5[%c0_10, %c0_11], %12 {strides = array<i32>} : memref<2x128xf32, #tpu.memory_space<vmem>>, vector<2x128xf32>,
    } else {
    }
    %c0 = arith.constant 0 : index
    %c0_1 = arith.constant 0 : index
    %3 = vector.load %arg5[%c0, %c0_1] : memref<2x128xf32, #tpu.memory_space<vmem>>, vector<2x128xf32>
    %c0_2 = arith.constant 0 : index
    %c0_3 = arith.constant 0 : index
    %c0_4 = arith.constant 0 : index
    %4 = vector.load %arg1[%c0_2, %c0_3, %c0_4] : memref<2x16x128xbf16, #tpu.memory_space<vmem>>, vector<2x16x128xbf16>
    %5 = arith.extf %4 : vector<2x16x128xbf16> to vector<2x16x128xf32>
    %cst = arith.constant dense<0.000000e+00> : vector<2x128xf32>
    %6 = vector.multi_reduction <add>, %5, %cst [1] : vector<2x16x128xf32> to vector<2x128xf32>
    %7 = arith.addf %3, %6 : vector<2x128xf32>
    %c0_5 = arith.constant 0 : index
    %c0_6 = arith.constant 0 : index
    %8 = vector.load %arg5[%c0_5, %c0_6] : memref<2x128xf32, #tpu.memory_space<vmem>>, vector<2x128xf32>
    tpu.vector_store %arg5[%c0_5, %c0_6], %7 {strides = array<i32>} : memref<2x128xf32, #tpu.memory_space<vmem>>, vector<2x128xf32>,
    %c0_i32_7 = arith.constant 0 : i32
    %9 = arith.cmpi eq, %arg0, %c0_i32_7 : i32
    %10 = arith.extui %9 : i1 to i32
    %c0_i32_8 = arith.constant 0 : i32
    %11 = arith.cmpi ne, %10, %c0_i32_8 : i32
    scf.if %11 {
      %c0_9 = arith.constant 0 : index
      %c0_10 = arith.constant 0 : index
      %12 = vector.load %arg5[%c0_9, %c0_10] : memref<2x128xf32, #tpu.memory_space<vmem>>, vector<2x128xf32>
      %cst_11 = arith.constant 6.250000e-02 : f32
      %13 = vector.broadcast %cst_11 : f32 to vector<2x128xf32>
      %14 = arith.mulf %12, %13 : vector<2x128xf32>
      %c0_12 = arith.constant 0 : index
      %c0_13 = arith.constant 0 : index
      %15 = vector.load %arg2[%c0_12, %c0_13] : memref<128x128xf32, #tpu.memory_space<vmem>>, vector<128x128xf32>
      %cst_14 = arith.constant dense<0.000000e+00> : vector<2x128xf32>
      %16 = tpu.matmul %14, %15, %cst_14 {dimension_numbers = #tpu.dot_dimension_numbers<[1], [0], [0], [1], [0, 0, 1, 1], [], []>} : vector<2x128xf32>, vector<128x128xf32>, vector<2x128xf32> -> vector<2x128xf32>
      %c0_15 = arith.constant 0 : index
      %c0_16 = arith.constant 0 : index
      %17 = vector.load %arg3[%c0_15, %c0_16] : memref<1x128xf32, #tpu.memory_space<vmem>>, vector<1x128xf32>
      %18 = vector.broadcast %17 : vector<1x128xf32> to vector<2x128xf32>
      %19 = arith.addf %16, %18 : vector<2x128xf32>
      %c0_17 = arith.constant 0 : index
      %c0_18 = arith.constant 0 : index
      %20 = vector.load %arg4[%c0_17, %c0_18] : memref<2x128xf32, #tpu.memory_space<vmem>>, vector<2x128xf32>
      tpu.vector_store %arg4[%c0_17, %c0_18], %19 {strides = array<i32>} : memref<2x128xf32, #tpu.memory_space<vmem>>, vector<2x128xf32>,
    } else {
    }
    return
  }
  func.func @transform_0(%arg0: i32) -> (i32, i32, i32) {
    %c0_i32 = arith.constant 0 : i32
    %c0_i32_0 = arith.constant 0 : i32
    %c0_i32_1 = arith.constant 0 : i32
    return %c0_i32, %arg0, %c0_i32_0 : i32, i32, i32
  }
  func.func @transform_1(%arg0: i32) -> (i32, i32) {
    %c0_i32 = arith.constant 0 : i32
    %c0_i32_0 = arith.constant 0 : i32
    %c0_i32_1 = arith.constant 0 : i32
    return %c0_i32, %c0_i32_0 : i32, i32
  }
  func.func @transform_2(%arg0: i32) -> (i32, i32) {
    %c0_i32 = arith.constant 0 : i32
    %c0_i32_0 = arith.constant 0 : i32
    %c0_i32_1 = arith.constant 0 : i32
    return %c0_i32, %c0_i32_0 : i32, i32
  }
  func.func @transform_3(%arg0: i32) -> (i32, i32) {
    %c0_i32 = arith.constant 0 : i32
    %c0_i32_0 = arith.constant 0 : i32
    %c0_i32_1 = arith.constant 0 : i32
    return %c0_i32, %c0_i32_0 : i32, i32
  }
}

</mosaic_0001>

<bundles_post_ra>
// kernel: petals_to_metals_forward.6
= control target key start
LH: loop header
LB: loop body
LE: loop exit
PB: predicated region body
PF: predicated region fallthrough
CT: control target
= control target key end

     0   :  { %s970_s1 = inlined_call_operand.vmem [shape: bf16[640,128], index: 1, kind: input, shape index: {}]   ;;  %s971_s0 = inlined_call_operand.vmem [shape: bf16[32,640], index: 0, kind: input, shape index: {}]   ;;  %s972_s2 = inlined_call_operand.vmem [shape: f32[1,128], index: 2, kind: input, shape index: {}]   ;;  %s973_s3 = inlined_call_operand.vmem [shape: bf16[32,128], index: 3, kind: output, shape index: {}]  }
   0x1   :  { %v737_v0 = vld [vmem:[%s970_s1 + $0x40] sm:$0xff]   ;;  %v741_v4 = vld [vmem:[%s970_s1 + $0x48] sm:$0xff]   ;;  %v745_v8 = vld [vmem:[%s970_s1 + $0x50] sm:$0xff]  }
   0x2   :  { %v738_v1 = vld [vmem:[%s970_s1] sm:$0xff]   ;;  %651 = vmatprep.subr.bf16.mxu0 %v737_v0  ;;  %v742_v5 = vld [vmem:[%s970_s1 + $0x8] sm:$0xff]   ;;  %v746_v9 = vld [vmem:[%s970_s1 + $0x10] sm:$0xff]  }
   0x3   :  { %v739_v2 = vld [vmem:[%s970_s1 + $0xc0] sm:$0xff]   ;;  %652 = vmatpush3.bf16.msra.mxu0 %v738_v1  ;;  %v743_v6 = vld [vmem:[%s970_s1 + $0xc8] sm:$0xff]   ;;  %v747_v10 = vld [vmem:[%s970_s1 + $0xd0] sm:$0xff]  }
   0x4   :  { %v740_v3 = vld [vmem:[%s970_s1 + $0x80] sm:$0xff]   ;;  %679 = vmatprep.subr.bf16.mxu1 %v739_v2  ;;  %653 = vmatprep.subr.bf16.mxu0 %v741_v4  ;;  %v744_v7 = vld [vmem:[%s970_s1 + $0x88] sm:$0xff]   ;;  %v748_v11 = vld [vmem:[%s970_s1 + $0x90] sm:$0xff]  }
   0x5   :  { %680 = vmatpush3.bf16.msra.mxu1 %v740_v3  ;;  %v749_v12 = vld [vmem:[%s970_s1 + $0x58] sm:$0xff]   ;;  %v753_v16 = vld [vmem:[%s970_s1 + $0x60] sm:$0xff]   ;;  %v757_v20 = vld [vmem:[%s970_s1 + $0x68] sm:$0xff]  }
   0x6   :  { %681 = vmatprep.subr.bf16.mxu1 %v743_v6  ;;  %v750_v13 = vld [vmem:[%s970_s1 + $0x18] sm:$0xff]   ;;  %v754_v17 = vld [vmem:[%s970_s1 + $0x20] sm:$0xff]   ;;  %v758_v21 = vld [vmem:[%s970_s1 + $0x28] sm:$0xff]  }
   0x7   :  { %654 = vmatpush3.bf16.msra.mxu0 %v742_v5  ;;  %v751_v14 = vld [vmem:[%s970_s1 + $0xd8] sm:$0xff]   ;;  %v755_v18 = vld [vmem:[%s970_s1 + $0xe0] sm:$0xff]   ;;  %v759_v22 = vld [vmem:[%s970_s1 + $0xe8] sm:$0xff]  }
   0x8   :  { %655 = vmatprep.subr.bf16.mxu0 %v745_v8  ;;  %v752_v15 = vld [vmem:[%s970_s1 + $0x98] sm:$0xff]   ;;  %v756_v19 = vld [vmem:[%s970_s1 + $0xa0] sm:$0xff]   ;;  %v760_v23 = vld [vmem:[%s970_s1 + $0xa8] sm:$0xff]  }
   0x9   :  { %682 = vmatpush3.bf16.msra.mxu1 %v744_v7  ;;  %v761_v24 = vld [vmem:[%s970_s1 + $0x70] sm:$0xff]   ;;  %v765_v28 = vld [vmem:[%s970_s1 + $0x78] sm:$0xff]   ;;  %v772_v34 = vld [vmem:[%s970_s1 + $0x100] sm:$0xff]  }
   0xa   :  { %683 = vmatprep.subr.bf16.mxu1 %v747_v10  ;;  %v762_v25 = vld [vmem:[%s970_s1 + $0x30] sm:$0xff]   ;;  %v766_v29 = vld [vmem:[%s970_s1 + $0x38] sm:$0xff]   ;;  %v775_v36 = vld [vmem:[%s971_s0 + $0xc] ss:$20 sps:$4 sm:$0xff]  }
   0xb   :  { %656 = vmatpush3.bf16.msra.mxu0 %v746_v9  ;;  %v763_v26 = vld [vmem:[%s970_s1 + $0xf0] sm:$0xff]   ;;  %v767_v30 = vld [vmem:[%s970_s1 + $0xf8] sm:$0xff]   ;;  %v776_v37 = vld [vmem:[%s970_s1 + $0x108] sm:$0xff]   ;;  %487 = vmatprep.mubr.bf16.mxu1 %v775_v36 }
   0xc   :  { %657 = vmatprep.subr.bf16.mxu0 %v749_v12  ;;  %v764_v27 = vld [vmem:[%s970_s1 + $0xb0] sm:$0xff]   ;;  %v770_v32 = vld [vmem:[%s971_s0 + $0x4] ss:$20 sps:$4 sm:$0xff]   ;;  %v773_v35 = vld [vmem:[%s971_s0 + $0x8] ss:$20 sps:$4 sm:$0xff]  }
   0xd   :  { %684 = vmatpush3.bf16.msra.mxu1 %v748_v11  ;;  %v768_v31 = vld [vmem:[%s971_s0] ss:$20 sps:$4 sm:$0xff]   ;;  %v771_v33 = vld [vmem:[%s970_s1 + $0xb8] sm:$0xff]   ;;  %438 = vmatprep.mubr.bf16.mxu0 %v770_v32  ;;  %v786_v43 = vld [vmem:[%s971_s0 + $0x30] ss:$20 sps:$4 sm:$0xff]  }
   0xe   :  { %685 = vmatprep.subr.bf16.mxu1 %v751_v14  ;;  %v777_v38 = vld [vmem:[%s970_s1 + $0x110] sm:$0xff]   ;;  %v780_v39 = vld [vmem:[%s971_s0 + $0x2c] ss:$20 sps:$4 sm:$0xff]   ;;  %v778_v40 = vld [vmem:[%s970_s1 + $0x118] sm:$0xff]  }
   0xf   :  { %658 = vmatpush3.bf16.msra.mxu0 %v750_v13  ;;  %v783_v41 = vld [vmem:[%s971_s0 + $0x28] ss:$20 sps:$4 sm:$0xff]   ;;  %v779_v44 = vld [vmem:[%s970_s1 + $0x120] sm:$0xff]   ;;  %v787_v47 = vld [vmem:[%s970_s1 + $0x130] sm:$0xff]  }
  0x10   :  { %659 = vmatprep.subr.bf16.mxu0 %v753_v16  ;;  %v784_v42 = vld [vmem:[%s971_s0 + $0x34] ss:$20 sps:$4 sm:$0xff]   ;;  %v789_v45 = vld [vmem:[%s971_s0 + $0x10] ss:$20 sps:$4 sm:$0xff]   ;;  %v788_v48 = vld [vmem:[%s970_s1 + $0x138] sm:$0xff]  }
  0x11   :  { %686 = vmatpush3.bf16.msra.mxu1 %v752_v15  ;;  %v782_v46 = vld [vmem:[%s970_s1 + $0x128] sm:$0xff]   ;;  %v581_v51 = vld [vmem:[%s972_s2] ss:$0 sm:$0xff] }
  0x12   :  { %687 = vmatprep.subr.bf16.mxu1 %v755_v18  ;;  %v790_v49 = vld [vmem:[%s971_s0 + $0x38] ss:$20 sps:$4 sm:$0xff]  }
  0x13   :  { %660 = vmatpush3.bf16.msra.mxu0 %v754_v17 }
  0x14   :  { %661 = vmatprep.subr.bf16.mxu0 %v757_v20 }
  0x15   :  { %688 = vmatpush3.bf16.msra.mxu1 %v756_v19 }
  0x16   :  { %689 = vmatprep.subr.bf16.mxu1 %v759_v22 }
  0x17   :  { %662 = vmatpush3.bf16.msra.mxu0 %v758_v21 }
  0x18   :  { %663 = vmatprep.subr.bf16.mxu0 %v761_v24 }
  0x19   :  { %690 = vmatpush3.bf16.msra.mxu1 %v760_v23 }
  0x1a   :  { %691 = vmatprep.subr.bf16.mxu1 %v763_v26 }
  0x1b   :  { %664 = vmatpush3.bf16.msra.mxu0 %v762_v25 }
  0x1c   :  { %665 = vmatprep.subr.bf16.mxu0 %v765_v28 }
  0x1d   :  { %692 = vmatpush3.bf16.msra.mxu1 %v764_v27 }
  0x1e   :  { %693 = vmatprep.subr.bf16.mxu1 %v767_v30 }
  0x1f   :  { %666 = vmatpush3.bf16.msra.mxu0 %v766_v29 }
  0x20   :  { %717 = vmatprep.subr.bf16.mxu0 %v772_v34 }
  0x21   :  { %694 = vmatpush3.bf16.msra.mxu1 %v771_v33 }
  0x22   :  { %439 = vmatmul.mubr.bf16.vlgmr.msra.gmra.mrb[0].mxu0 %v768_v31 }
  0x23   :  { %718 = vmatpush3.bf16.msra.mxu0 %v772_v34  ;;  %446 = vmatprep.mubr.bf16.mxu0 %v780_v39 }
  0x24   :  { %488 = vmatmul.mubr.bf16.vlgmr.msra.gmra.mrb[0].mxu1 %v773_v35  ;;  %719 = vmatprep.subr.bf16.mxu0 %v776_v37 }
  0x25   :  { %495 = vmatprep.mubr.bf16.mxu1 %v784_v42 }
  0x27   :  { %720 = vmatpush3.bf16.msra.mxu0 %v776_v37 }
  0x28   :  { %721 = vmatprep.subr.bf16.mxu0 %v777_v38 }
  0x2a   :  { %447 = vmatmul.mubr.bf16.gmra.mrb[4].mxu0 %v783_v41 }
  0x2b   :  { %722 = vmatpush3.bf16.msra.mxu0 %v777_v38  ;;  %733 = vmatprep.mubr.bf16.mxu0 %v789_v45 }
  0x2c   :  { %723 = vmatprep.subr.bf16.mxu0 %v778_v40  ;;  %496 = vmatmul.mubr.bf16.gmra.mrb[4].mxu1 %v786_v43 }
  0x2f   :  { %724 = vmatpush3.bf16.msra.mxu0 %v778_v40 }
  0x30   :  { %725 = vmatprep.subr.bf16.mxu0 %v779_v44 }
  0x33   :  { %726 = vmatpush3.bf16.msra.mxu0 %v779_v44 }
  0x34   :  { %727 = vmatprep.subr.bf16.mxu0 %v782_v46 }
  0x37   :  { %728 = vmatpush3.bf16.msra.mxu0 %v782_v46 }
  0x38   :  { %729 = vmatprep.subr.bf16.mxu0 %v787_v47 }
  0x3b   :  { %730 = vmatpush3.bf16.msra.mxu0 %v787_v47 }
  0x3c   :  { %731 = vmatprep.subr.bf16.mxu0 %v788_v48 }
  0x3f   :  { %732 = vmatpush3.bf16.msra.mxu0 %v788_v48 }
  0x42   :  { %734 = vmatmul.mubr.bf16.vlgmr.msra.gmra.mrb[8].mxu0 %v790_v49 }
  0xf5   :  { %v667_v50 = vpop.f32.mrb[0].mxu0 }
  0xf6   :  { %v668_v52 = vpop.f32.mrb[1].mxu0 }
  0xf7   :  { %v669_v53 = vadd.f32 %v668_v52, %v667_v50  ;;  %v670_v54 = vpop.f32.mrb[2].mxu0  ;;  %v695_v55 = vpop.f32.mrb[0].mxu1 }
  0xf8   :  { %v671_v56 = vpop.f32.mrb[3].mxu0  ;;  %v696_v59 = vpop.f32.mrb[1].mxu1 }
  0xf9   :  { %v441_v57 = vadd.f32 %v669_v53, %v581_v51  ;;  %v672_v58 = vadd.f32 %v671_v56, %v670_v54  ;;  %v697_v60 = vadd.f32 %v696_v59, %v695_v55  ;;  %v698_v61 = vpop.f32.mrb[2].mxu1 }
  0xfa   :  { %v699_v63 = vpop.f32.mrb[3].mxu1 }
  0xfb   :  { %v444_v62 = vadd.f32 %v672_v58, %v581_v51  ;;  %v700_v0 = vadd.f32 %v699_v63, %v698_v61  ;;  %v490_v1 = vadd.f32 %v697_v60, %v441_v57 }
  0xfd   :  { %v673_v2 = vpop.f32.mrb[4].mxu0  ;;  %v493_v4 = vadd.f32 %v700_v0, %v444_v62 }
  0xfe   :  { %v674_v3 = vpop.f32.mrb[5].mxu0 }
  0xff   :  { %v675_v5 = vadd.f32 %v674_v3, %v673_v2  ;;  %v676_v6 = vpop.f32.mrb[6].mxu0  ;;  %v701_v7 = vpop.f32.mrb[4].mxu1 }
 0x100   :  { %v677_v8 = vpop.f32.mrb[7].mxu0  ;;  %v702_v11 = vpop.f32.mrb[5].mxu1 }
 0x101   :  { %v449_v9 = vadd.f32 %v675_v5, %v581_v51  ;;  %v678_v10 = vadd.f32 %v677_v8, %v676_v6  ;;  %v703_v12 = vadd.f32 %v702_v11, %v701_v7  ;;  %v704_v13 = vpop.f32.mrb[6].mxu1 }
 0x102   :  { %v705_v15 = vpop.f32.mrb[7].mxu1 }
 0x103   :  { %v452_v14 = vadd.f32 %v678_v10, %v581_v51  ;;  %v706_v16 = vadd.f32 %v705_v15, %v704_v13  ;;  %v498_v17 = vadd.f32 %v703_v12, %v449_v9 }
 0x105   :  { %v501_v18 = vadd.f32 %v706_v16, %v452_v14 }
 0x115   :  { %v735_v19 = vpop.f32.mrb[8].mxu0 }
 0x116   :  { %v547_v20 = vadd.f32 %v735_v19, %v498_v17  ;;  %v538_v21 = vpop.f32.mrb[9].mxu0 }
 0x117   :  { %v539_v22 = vadd.f32 %v538_v21, %v490_v1  ;;  %v736_v23 = vpop.f32.mrb[10].mxu0 }
 0x118   :  { %v550_v24 = vadd.f32 %v736_v23, %v501_v18  ;;  %v541_v25 = vpop.f32.mrb[11].mxu0  ;;  %v555_v27 = vmax.f32 %v547_v20, 0.0 }
 0x119   :  { %v542_v26 = vadd.f32 %v541_v25, %v493_v4  ;;  %v553_v29 = vmax.f32 %v539_v22, 0.0 }
 0x11a   :  { %v556_v28 = vmax.f32 %v550_v24, 0.0 }
 0x11b   :  { %v554_v30 = vmax.f32 %v542_v26, 0.0 }
 0x11c   :  { %v648_v31 = vpack.c.bf16 %v556_v28, %v555_v27 }
 0x11d   :  { %v643_v32 = vpack.c.bf16 %v554_v30, %v553_v29 }
 0x11e   :  { %650 = vst [vmem:[%s973_s3 + $0x8] sm:$0xff] %v648_v31  }
 0x11f   :  { %644 = vst [vmem:[%s973_s3] sm:$0xff] %v643_v32  }

// kernel: petals_to_metals_forward.5
= control target key start
LH: loop header
LB: loop body
LE: loop exit
PB: predicated region body
PF: predicated region fallthrough
CT: control target
= control target key end

     0   :  { %vm68_vm0 = vcmask 523264   ;;  %s247_s1 = inlined_call_operand.vmem [shape: bf16[64,128], index: 1, kind: input, shape index: {}]   ;;  %s248_s0 = inlined_call_operand.vmem [shape: bf16[32,64], index: 0, kind: input, shape index: {}]   ;;  %s249_s2 = inlined_call_operand.vmem [shape: f32[1,128], index: 2, kind: input, shape index: {}]   ;;  %s250_s3 = inlined_call_operand.vmem [shape: bf16[32,128], index: 3, kind: output, shape index: {}]  }
   0x1   :  { %v194_v0 = vld [vmem:[%s247_s1] sm:$0xff]   ;;  %v195_v1 = vld [vmem:[%s247_s1 + $0x8] sm:$0xff]   ;;  %v196_v2 = vld [vmem:[%s247_s1 + $0x10] sm:$0xff]  }
   0x2   :  { %182 = vmatprep.subr.bf16.mxu0 %v194_v0  ;;  %v198_v3 = vld [vmem:[%s248_s0] sm:$0xff]   ;;  %v197_v4 = vld [vmem:[%s247_s1 + $0x18] sm:$0xff]   ;;  %v199_v5 = vld [vmem:[%s248_s0 + $0x8] sm:$0xff]  }
   0x3   :  { %183 = vmatpush3.bf16.msra.mxu0 %v194_v0  ;;  %190 = vmatprep.mubr.msk.bf16.mxu0 %vm68_vm0, %v198_v3  ;;  %v148_v7 = vld [vmem:[%s249_s2] ss:$0 sm:$0xff] }
   0x4   :  { %184 = vmatprep.subr.bf16.mxu0 %v195_v1 }
   0x7   :  { %185 = vmatpush3.bf16.msra.mxu0 %v195_v1 }
   0x8   :  { %186 = vmatprep.subr.bf16.mxu0 %v196_v2 }
   0xb   :  { %187 = vmatpush3.bf16.msra.mxu0 %v196_v2 }
   0xc   :  { %188 = vmatprep.subr.bf16.mxu0 %v197_v4 }
   0xf   :  { %189 = vmatpush3.bf16.msra.mxu0 %v197_v4 }
  0x12   :  { %191 = vmatmul.mubr.msk.bf16.vlgmr.msra.gmra.mrb[0].mxu0 %vm68_vm0, %v199_v5 }
  0xe5   :  { %v192_v6 = vpop.f32.mrb[0].mxu0 }
  0xe6   :  { %v109_v8 = vpop.f32.mrb[1].mxu0  ;;  %v118_v10 = vadd.f32 %v192_v6, %v148_v7 }
  0xe7   :  { %v193_v9 = vpop.f32.mrb[2].mxu0  ;;  %v110_v13 = vadd.f32 %v148_v7, %v109_v8 }
  0xe8   :  { %v121_v11 = vadd.f32 %v193_v9, %v148_v7  ;;  %v112_v12 = vpop.f32.mrb[3].mxu0 }
  0xe9   :  { %v113_v14 = vadd.f32 %v148_v7, %v112_v12 }
  0xea   :  { %v173_v15 = vpack.c.bf16 %v121_v11, %v118_v10 }
  0xeb   :  { %v168_v16 = vpack.c.bf16 %v113_v14, %v110_v13 }
  0xec   :  { %175 = vst [vmem:[%s250_s3 + $0x8] sm:$0xff] %v173_v15  }
  0xed   :  { %169 = vst [vmem:[%s250_s3] sm:$0xff] %v168_v16  }

// kernel: petals_to_metals_forward.7
= control target key start
LH: loop header
LB: loop body
LE: loop exit
PB: predicated region body
PF: predicated region fallthrough
CT: control target
= control target key end

     0   :  { %s2192_s12 = smov 0   ;;  %s2472_s0 = inlined_call_operand.vmem [shape: bf16[2,40,128], index: 0, kind: input, shape index: {}]   ;;  %s2473_s1 = inlined_call_operand.vmem [shape: bf16[9,128,128], index: 1, kind: input, shape index: {}]   ;;  %s2474_s2 = inlined_call_operand.vmem [shape: f32[1,128], index: 2, kind: input, shape index: {}]   ;;  %s2475_s3 = inlined_call_operand.vmem [shape: bf16[2,24,128], index: 3, kind: output, shape index: {}]  }
   0x1 LB: > { %s1555_s13 = sadd.s32 4294967295, %s2170_s12   ;;  %p1559_p0 = scmp.ge.s32.totalorder %s2170_s12, 1  ;;  %s2170_s12 = sphi %s2192_s12, %s13_s12  }
   0x2   : > { %p137_p1 = scmp.lt.s32.totalorder %s2170_s12, 3 }
   0x4   : > { %p138_p2 = pnand %p1559_p0, %p137_p1 }
   0x5   : > { %v2074_v0 = vld [vmem:[%s2473_s1] sm:$0xff] (!%p138_p2)   ;;  %v2076_v2 = vld [vmem:[%s2473_s1 + $0x8] sm:$0xff] (!%p138_p2)   ;;  %p161_p3 = scmp.lt.s32.totalorder (!%p138_p2), %s1555_s13, 1  ;;  %v2078_v4 = vld [vmem:[%s2473_s1 + $0x10] sm:$0xff] (!%p138_p2)   ;;  %vm331_vm0 = vsmask.f32 (!%p138_p2), 7424 }
   0x6   : > { %141 = sbr.rel (%p138_p2) target bundleno = 390 (0x186), region = 32  ;;  %v2075_v1 = vld [vmem:[%s2473_s1 + $0x40] sm:$0xff] (!%p138_p2)   ;;  %1884 = vmatprep.subr.bf16.mxu0 (!%p138_p2), %v2074_v0  ;;  %v2077_v3 = vld [vmem:[%s2473_s1 + $0x48] sm:$0xff] (!%p138_p2)   ;;  %v2079_v5 = vld [vmem:[%s2473_s1 + $0x50] sm:$0xff] (!%p138_p2)   ;;  %vm485_vm1 = vcmask (!%p138_p2), 1046528   ;;  %vm627_vm2 = vcmask (!%p138_p2), 1044480  }
   0x7   : > { %1904 = vmatprep.subr.bf16.mxu1 (!%p138_p2), %v2075_v1  ;;  %1885 = vmatpush3.bf16.msra.mxu0 (!%p138_p2), %v2074_v0  ;;  %v2080_v6 = vld [vmem:[%s2473_s1 + $0x18] sm:$0xff] (!%p138_p2)   ;;  %v2082_v8 = vld [vmem:[%s2473_s1 + $0x20] sm:$0xff] (!%p138_p2)   ;;  %v2084_v10 = vld [vmem:[%s2473_s1 + $0x28] sm:$0xff] (!%p138_p2)   ;;  %vm769_vm3 = vsmask.f32 (!%p138_p2), 4352  ;;  %vm1060_vm4 = vcmask (!%p138_p2), 1045504  }
   0x8   : > { %1905 = vmatpush3.bf16.msra.mxu1 (!%p138_p2), %v2075_v1  ;;  %1886 = vmatprep.subr.bf16.mxu0 (!%p138_p2), %v2076_v2  ;;  %v2081_v7 = vld [vmem:[%s2473_s1 + $0x58] sm:$0xff] (!%p138_p2)   ;;  %v2083_v9 = vld [vmem:[%s2473_s1 + $0x60] sm:$0xff] (!%p138_p2)   ;;  %v2085_v11 = vld [vmem:[%s2473_s1 + $0x68] sm:$0xff] (!%p138_p2)   ;;  %vm1202_vm5 = vsmask.f32 (!%p138_p2), 5376 }
   0x9   : > { %1906 = vmatprep.subr.bf16.mxu1 (!%p138_p2), %v2077_v3  ;;  %v2086_v15 = vld [vmem:[%s2473_s1 + $0x30] sm:$0xff] (!%p138_p2)   ;;  %v2088_v22 = vld [vmem:[%s2473_s1 + $0x38] sm:$0xff] (!%p138_p2)   ;;  %v2094_v27 = vld [vmem:[%s2473_s1 + $0x80] sm:$0xff] (!%p138_p2)  }
   0xa   : > { %v2087_v19 = vld [vmem:[%s2473_s1 + $0x70] sm:$0xff] (!%p138_p2)   ;;  %v2089_v24 = vld [vmem:[%s2473_s1 + $0x78] sm:$0xff] (!%p138_p2)   ;;  %v2095_v28 = vld [vmem:[%s2473_s1 + $0xc0] sm:$0xff] (!%p138_p2)  }
   0xb   : > { %1887 = vmatpush3.bf16.msra.mxu0 (!%p138_p2), %v2076_v2  ;;  %v2096_v31 = vld [vmem:[%s2473_s1 + $0x88] sm:$0xff] (!%p138_p2)   ;;  %v2098_v33 = vld [vmem:[%s2473_s1 + $0x90] sm:$0xff] (!%p138_p2)   ;;  %v2100_v35 = vld [vmem:[%s2473_s1 + $0x98] sm:$0xff] (!%p138_p2)  }
   0xc   : > { %1907 = vmatpush3.bf16.msra.mxu1 (!%p138_p2), %v2077_v3  ;;  %1888 = vmatprep.subr.bf16.mxu0 (!%p138_p2), %v2078_v4  ;;  %v2097_v32 = vld [vmem:[%s2473_s1 + $0xc8] sm:$0xff] (!%p138_p2)   ;;  %v2099_v34 = vld [vmem:[%s2473_s1 + $0xd0] sm:$0xff] (!%p138_p2)   ;;  %v2101_v38 = vld [vmem:[%s2473_s1 + $0xd8] sm:$0xff] (!%p138_p2)  }
   0xd   : > { %s2477_s13 = smov (!%p161_p3, %s1555_s13), 1  ;;  %1908 = vmatprep.subr.bf16.mxu1 %v2079_v5  ;;  %v2102_v46 = vld [vmem:[%s2473_s1 + $0xa0] sm:$0xff]   ;;  %v2104_v49 = vld [vmem:[%s2473_s1 + $0xa8] sm:$0xff]   ;;  %v2106_v51 = vld [vmem:[%s2473_s1 + $0xb0] sm:$0xff]  }
   0xe   : > { %s2064_s30 = smul.u32 20, %s2477_s13  ;;  %v2103_v47 = vld [vmem:[%s2473_s1 + $0xe0] sm:$0xff]   ;;  %v2105_v50 = vld [vmem:[%s2473_s1 + $0xe8] sm:$0xff]   ;;  %v2107_v52 = vld [vmem:[%s2473_s1 + $0xf0] sm:$0xff]  }
   0xf   : > { %1889 = vmatpush3.bf16.msra.mxu0 %v2078_v4  ;;  %v2108_v53 = vld [vmem:[%s2473_s1 + $0xb8] sm:$0xff]   ;;  %v2112_v56 = vld [vmem:[%s2473_s1 + $0x100] sm:$0xff]   ;;  %v2116_v63 = vld [vmem:[%s2473_s1 + $0x108] sm:$0xff]   ;;  %s2065_s18 = smul.u32 12, %s2477_s13 }
  0x10   : > { %1909 = vmatpush3.bf16.msra.mxu1 %v2079_v5  ;;  %1890 = vmatprep.subr.bf16.mxu0 %v2080_v6  ;;  %s2242_s16 = scalar_lea.vmem %s2472_s0, %s2064_s30  ;;  %v2109_v54 = vld [vmem:[%s2473_s1 + $0xf8] sm:$0xff]   ;;  %v2115_v60 = vld [vmem:[%s2473_s1 + $0x140] sm:$0xff]   ;;  %v2117_v5 = vld [vmem:[%s2473_s1 + $0x148] sm:$0xff]  }
  0x11   : > { %1910 = vmatprep.subr.bf16.mxu1 %v2081_v7  ;;  %v2090_v12 = vld [vmem:[%s2242_s16] sm:$0xff]   ;;  %v2092_v14 = vld [vmem:[%s2242_s16 + $0x8] sm:$0x1f]   ;;  %s170_s21 = scalar_lea.vmem %s2475_s3, %s2065_s18 }
  0x12   : > { %1900 = vmatprep.mubr.bf16.mxu0 %v2090_v12  ;;  %v2091_v13 = vld [vmem:[%s2242_s16] sm:$0xff]   ;;  %v340_v18 = vshll.u32 %v2092_v14, 16  ;;  %v344_v26 = vshrl.u32 %v2092_v14, 16  ;;  %v2093_v29 = vld [vmem:[%s2242_s16 + $0x8] ss:$0 sps:$4 sm:$0xff]   ;;  %v2121_v12 = vld [vmem:[%s2473_s1 + $0x158] sm:$0xff]  }
  0x13   : > { %1891 = vmatpush3.bf16.msra.mxu0 %v2080_v6  ;;  %v333_v16 = vshrl.u32 %v2091_v13, 16  ;;  %v335_v17 = vshll.u32 %v2091_v13, 16  ;;  %v2110_v36 = vld [vmem:[%s2242_s16] sm:$0xfe]   ;;  %v2283_v37 = vld [vmem:[%s2242_s16 + $0x8] sm:$0x1f]  }
  0x14   : > { %1911 = vmatpush3.bf16.msra.mxu1 %v2081_v7  ;;  %1892 = vmatprep.subr.bf16.mxu0 %v2082_v8  ;;  %v342_v21 = vrot.slane %v340_v18, 1  ;;  %v486_v39 = vrot.slane %v2110_v36, 1  ;;  %v487_v40 = vrot.slane %v2283_v37, 1  ;;  %v2113_v41 = vld [vmem:[%s2242_s16] sm:$0xf8]   ;;  %v2131_v57 = vld [vmem:[%s2242_s16 + $0x8] sm:$0xff]  }
  0x15   : > { %1912 = vmatprep.subr.bf16.mxu1 %v2083_v9  ;;  %v337_v20 = vrot.slane %v335_v17, 1  ;;  %v2114_v42 = vld [vmem:[%s2242_s16 + $0x8] sm:$0x7f]   ;;  %v628_v44 = vrot.slane %v2113_v41, 3  ;;  %v2130_v55 = vld [vmem:[%s2242_s16] sm:$0xf8]  }
  0x16   : > { %v346_v30 = vor.u32 %v344_v26, %v342_v21  ;;  %v488_v43 = vsel %vm485_vm1, %v486_v39, %v487_v40  ;;  %v629_v45 = vrot.slane %v2114_v42, 3  ;;  %v771_v58 = vshrl.u32 %v2130_v55, 16  ;;  %v2133_v7 = vld [vmem:[%s2242_s16 + $0x4] sm:$0xff]   ;;  %v2154_v18 = vld [vmem:[%s2242_s16 + $0xc] sm:$0x7f]  }
  0x17   : > { %1893 = vmatpush3.bf16.msra.mxu0 %v2082_v8  ;;  %v338_v23 = vor.u32 %v337_v20, %v333_v16  ;;  %v774_v59 = vshll.u32 %v2130_v55, 16  ;;  %v779_v61 = vshrl.u32 %v2131_v57, 16  ;;  %v782_v62 = vshll.u32 %v2131_v57, 16  ;;  %v2122_v13 = vld [vmem:[%s2473_s1 + $0x120] sm:$0xff]   ;;  %v2125_v16 = vld [vmem:[%s2473_s1 + $0x168] sm:$0xff]   ;;  %v2127_v20 = vld [vmem:[%s2473_s1 + $0x170] sm:$0xff]  }
  0x18   : > { %1913 = vmatpush3.bf16.msra.mxu1 %v2083_v9  ;;  %1894 = vmatprep.subr.bf16.mxu0 %v2084_v10  ;;  %v630_v48 = vsel %vm627_vm2, %v628_v44, %v629_v45  ;;  %v773_v0 = vrot.slane %v771_v58, 3  ;;  %v2118_v9 = vld [vmem:[%s2473_s1 + $0x110] sm:$0xff]   ;;  %v2123_v14 = vld [vmem:[%s2473_s1 + $0x160] sm:$0xff]   ;;  %v1215_v26 = vshll.u32 %v2154_v18, 16  ;;  %v2134_v37 = vld [vmem:[%s2242_s16 + $0xc] ss:$0 sps:$4 sm:$0xff]  }
  0x19   : > { %1914 = vmatprep.subr.bf16.mxu1 %v2085_v11  ;;  %v343_v25 = vsel %vm331_vm0, %v338_v23, %v342_v21  ;;  %v776_v1 = vrot.slane %v774_v59, 4  ;;  %v781_v2 = vrot.slane %v779_v61, 3  ;;  %v784_v3 = vrot.slane %v782_v62, 4  ;;  %v2153_v17 = vld [vmem:[%s2242_s16 + $0x4] sm:$0xfc]   ;;  %v2128_v23 = vld [vmem:[%s2473_s1 + $0x138] sm:$0xff]  }
  0x1a   : > { %1920 = vmatprep.mubr.bf16.mxu1 %v343_v25  ;;  %v1204_v21 = vshrl.u32 %v2153_v17, 16  ;;  %v1212_v25 = vshrl.u32 %v2154_v18, 16  ;;  %v2137_v41 = vld [vmem:[%s2473_s1 + $0x1c8] sm:$0xff]   ;;  %v2138_v44 = vld [vmem:[%s2473_s1 + $0x190] sm:$0xff]   ;;  %v2149_v55 = vld [vmem:[%s2473_s1 + $0x1f8] sm:$0xff]  }
  0x1b   : > { %1895 = vmatpush3.bf16.msra.mxu0 %v2084_v10  ;;  %v777_v4 = vor.u32 %v776_v1, %v773_v0  ;;  %v2330_v6 = vor.u32 %v784_v3, %v781_v2  ;;  %v2119_v10 = vld [vmem:[%s2473_s1 + $0x150] sm:$0xff]   ;;  %v2152_v58 = vld [vmem:[%s2473_s1 + $0x200] sm:$0xff]   ;;  %v2155_v61 = vld [vmem:[%s2473_s1 + $0x208] sm:$0xff]  }
  0x1c   : > { %1915 = vmatpush3.bf16.msra.mxu1 %v2085_v11  ;;  %1896 = vmatprep.subr.bf16.mxu0 %v2086_v15  ;;  %v2120_v11 = vld [vmem:[%s2473_s1 + $0x118] sm:$0xff]   ;;  %v2163_v57 = vld [vmem:[%s2242_s16 + $0xc] sm:$0x7f]   ;;  %v2158_v1 = vld [vmem:[%s2473_s1 + $0x220] sm:$0xff]  }
  0x1d   : > { %1916 = vmatprep.subr.bf16.mxu1 %v2087_v19  ;;  %v786_v8 = vsel %vm769_vm3, %v777_v4, %v2330_v6  ;;  %v2157_v0 = vld [vmem:[%s2473_s1 + $0x218] sm:$0xff]   ;;  %v2159_v2 = vld [vmem:[%s2473_s1 + $0x228] sm:$0xff]   ;;  %v2160_v3 = vld [vmem:[%s2473_s1 + $0x230] sm:$0xff]  }
  0x1e   : > { %v2161_v4 = vld [vmem:[%s2473_s1 + $0x238] sm:$0xff]  }
  0x1f   : > { %1897 = vmatpush3.bf16.msra.mxu0 %v2086_v15  ;;  %v2124_v15 = vld [vmem:[%s2473_s1 + $0x128] sm:$0xff]  }
  0x20   : > { %1917 = vmatpush3.bf16.msra.mxu1 %v2087_v19  ;;  %1898 = vmatprep.subr.bf16.mxu0 %v2088_v22  ;;  %v2126_v19 = vld [vmem:[%s2473_s1 + $0x130] sm:$0xff]  }
  0x21   : > { %1918 = vmatprep.subr.bf16.mxu1 %v2089_v24 }
  0x23   : > { %1899 = vmatpush3.bf16.msra.mxu0 %v2088_v22  ;;  %v1207_v22 = vshll.u32 %v2153_v17, 16 }
  0x24   : > { %1919 = vmatpush3.bf16.msra.mxu1 %v2089_v24  ;;  %1924 = vmatprep.subr.bf16.mxu0 %v2094_v27  ;;  %v2129_v24 = vld [vmem:[%s2473_s1 + $0x178] sm:$0xff]  }
  0x25   : > { %1944 = vmatprep.subr.bf16.mxu1 %v2095_v28 }
  0x26   : > { %1901 = vmatmul.mubr.bf16.vlgmr.msra.gmra.mrb[0].mxu0 %v2093_v29  ;;  %v1206_v29 = vrot.slane %v1204_v21, 2 }
  0x27   : > { %1921 = vmatmul.mubr.bf16.vlgmr.msra.gmra.mrb[0].mxu1 %v346_v30  ;;  %1925 = vmatpush3.bf16.msra.mxu0 %v2094_v27  ;;  %v2150_v27 = vld [vmem:[%s2242_s16 + $0x4] sm:$0xfc]   ;;  %v1209_v30 = vrot.slane %v1207_v22, 3 }
  0x28   : > { %1945 = vmatpush3.bf16.msra.mxu1 %v2095_v28  ;;  %1926 = vmatprep.subr.bf16.mxu0 %v2096_v31  ;;  %v2374_v28 = vld [vmem:[%s2242_s16 + $0xc] sm:$0x3f]  }
  0x29   : > { %1946 = vmatprep.subr.bf16.mxu1 %v2097_v32  ;;  %1940 = vmatprep.mubr.bf16.mxu0 %v488_v43  ;;  %v1062_v36 = vrot.slane %v2374_v28, 2 }
  0x2a   : > { %1960 = vmatprep.mubr.bf16.mxu1 %v630_v48  ;;  %v2142_v48 = vld [vmem:[%s2473_s1 + $0x1a0] sm:$0xff]  }
  0x2b   : > { %1927 = vmatpush3.bf16.msra.mxu0 %v2096_v31  ;;  %v1214_v31 = vrot.slane %v1212_v25, 2 }
  0x2c   : > { %1947 = vmatpush3.bf16.msra.mxu1 %v2097_v32  ;;  %1928 = vmatprep.subr.bf16.mxu0 %v2098_v33  ;;  %v1217_v32 = vrot.slane %v1215_v26, 3 }
  0x2d   : > { %1948 = vmatprep.subr.bf16.mxu1 %v2099_v34 }
  0x2e   : > { %v2384_v39 = vor.u32 %v1217_v32, %v1214_v31 }
  0x2f   : > { %1929 = vmatpush3.bf16.msra.mxu0 %v2098_v33  ;;  %v2132_v33 = vld [vmem:[%s2473_s1 + $0x180] sm:$0xff]  }
  0x30   : > { %1949 = vmatpush3.bf16.msra.mxu1 %v2099_v34  ;;  %1930 = vmatprep.subr.bf16.mxu0 %v2100_v35  ;;  %v2135_v34 = vld [vmem:[%s2473_s1 + $0x1c0] sm:$0xff]  }
  0x31   : > { %1950 = vmatprep.subr.bf16.mxu1 %v2101_v38 }
  0x33   : > { %1931 = vmatpush3.bf16.msra.mxu0 %v2100_v35  ;;  %v1061_v35 = vrot.slane %v2150_v27, 2 }
  0x34   : > { %1951 = vmatpush3.bf16.msra.mxu1 %v2101_v38  ;;  %1932 = vmatprep.subr.bf16.mxu0 %v2102_v46  ;;  %v1210_v38 = vor.u32 %v1209_v30, %v1206_v29 }
  0x35   : > { %1952 = vmatprep.subr.bf16.mxu1 %v2103_v47  ;;  %v1063_v42 = vsel %vm1060_vm4, %v1061_v35, %v1062_v36 }
  0x36   : > { %v1219_v43 = vsel %vm1202_vm5, %v1210_v38, %v2384_v39 }
  0x37   : > { %1933 = vmatpush3.bf16.msra.mxu0 %v2102_v46  ;;  %v2140_v46 = vld [vmem:[%s2473_s1 + $0x198] sm:$0xff]  }
  0x38   : > { %1953 = vmatpush3.bf16.msra.mxu1 %v2103_v47  ;;  %1934 = vmatprep.subr.bf16.mxu0 %v2104_v49  ;;  %v2141_v47 = vld [vmem:[%s2473_s1 + $0x1d8] sm:$0xff]  }
  0x39   : > { %1954 = vmatprep.subr.bf16.mxu1 %v2105_v50 }
  0x3b   : > { %1935 = vmatpush3.bf16.msra.mxu0 %v2104_v49  ;;  %v2143_v49 = vld [vmem:[%s2473_s1 + $0x1e0] sm:$0xff]  }
  0x3c   : > { %1955 = vmatpush3.bf16.msra.mxu1 %v2105_v50  ;;  %1936 = vmatprep.subr.bf16.mxu0 %v2106_v51  ;;  %v2144_v50 = vld [vmem:[%s2473_s1 + $0x1a8] sm:$0xff]  }
  0x3d   : > { %1956 = vmatprep.subr.bf16.mxu1 %v2107_v52 }
  0x3f   : > { %1937 = vmatpush3.bf16.msra.mxu0 %v2106_v51  ;;  %v2145_v51 = vld [vmem:[%s2473_s1 + $0x1e8] sm:$0xff]  }
  0x40   : > { %1957 = vmatpush3.bf16.msra.mxu1 %v2107_v52  ;;  %1938 = vmatprep.subr.bf16.mxu0 %v2108_v53  ;;  %v2146_v52 = vld [vmem:[%s2473_s1 + $0x1b0] sm:$0xff]  }
  0x41   : > { %1958 = vmatprep.subr.bf16.mxu1 %v2109_v54 }
  0x43   : > { %1939 = vmatpush3.bf16.msra.mxu0 %v2108_v53  ;;  %v2147_v53 = vld [vmem:[%s2473_s1 + $0x1f0] sm:$0xff]  }
  0x44   : > { %1959 = vmatpush3.bf16.msra.mxu1 %v2109_v54  ;;  %1964 = vmatprep.subr.bf16.mxu0 %v2112_v56  ;;  %v2148_v54 = vld [vmem:[%s2473_s1 + $0x1b8] sm:$0xff]  }
  0x45   : > { %1984 = vmatprep.subr.bf16.mxu1 %v2115_v60 }
  0x46   : > { %1941 = vmatmul.mubr.bf16.vlgmr.msra.gmra.mrb[4].mxu0 %v487_v40  ;;  %v2136_v40 = vld [vmem:[%s2473_s1 + $0x188] sm:$0xff]  }
  0x47   : > { %1965 = vmatpush3.bf16.msra.mxu0 %v2112_v56  ;;  %1961 = vmatmul.mubr.bf16.vlgmr.msra.gmra.mrb[4].mxu1 %v629_v45  ;;  %v2139_v45 = vld [vmem:[%s2473_s1 + $0x1d0] sm:$0xff]   ;;  %v2162_v56 = vld [vmem:[%s2242_s16 + $0x4] sm:$0xf8]  }
  0x48   : > { %1985 = vmatpush3.bf16.msra.mxu1 %v2115_v60  ;;  %1966 = vmatprep.subr.bf16.mxu0 %v2116_v63  ;;  %v1358_v59 = vrot.slane %v2162_v56, 3  ;;  %v1359_v60 = vrot.slane %v2163_v57, 3 }
  0x49   : > { %1986 = vmatprep.subr.bf16.mxu1 %v2117_v5  ;;  %1980 = vmatprep.mubr.bf16.mxu0 %v786_v8 }
  0x4a   : > { %2000 = vmatprep.mubr.bf16.mxu1 %v2133_v7  ;;  %v1360_v62 = vsel %vm627_vm2, %v1358_v59, %v1359_v60  ;;  %v1780_v59 = vld [vmem:[%s2474_s2] ss:$0 sm:$0xff] }
  0x4b   : > { %1967 = vmatpush3.bf16.msra.mxu0 %v2116_v63  ;;  %v2156_v63 = vld [vmem:[%s2473_s1 + $0x210] sm:$0xff]  }
  0x4c   : > { %1987 = vmatpush3.bf16.msra.mxu1 %v2117_v5  ;;  %1968 = vmatprep.subr.bf16.mxu0 %v2118_v9 }
  0x4d   : > { %1988 = vmatprep.subr.bf16.mxu1 %v2119_v10 }
  0x4f   : > { %1969 = vmatpush3.bf16.msra.mxu0 %v2118_v9 }
  0x50   : > { %1989 = vmatpush3.bf16.msra.mxu1 %v2119_v10  ;;  %1970 = vmatprep.subr.bf16.mxu0 %v2120_v11 }
  0x51   : > { %1990 = vmatprep.subr.bf16.mxu1 %v2121_v12 }
  0x53   : > { %1971 = vmatpush3.bf16.msra.mxu0 %v2120_v11 }
  0x54   : > { %1991 = vmatpush3.bf16.msra.mxu1 %v2121_v12  ;;  %1972 = vmatprep.subr.bf16.mxu0 %v2122_v13 }
  0x55   : > { %1992 = vmatprep.subr.bf16.mxu1 %v2123_v14 }
  0x57   : > { %1973 = vmatpush3.bf16.msra.mxu0 %v2122_v13 }
  0x58   : > { %1993 = vmatpush3.bf16.msra.mxu1 %v2123_v14  ;;  %1974 = vmatprep.subr.bf16.mxu0 %v2124_v15 }
  0x59   : > { %1994 = vmatprep.subr.bf16.mxu1 %v2125_v16 }
  0x5b   : > { %1975 = vmatpush3.bf16.msra.mxu0 %v2124_v15 }
  0x5c   : > { %1995 = vmatpush3.bf16.msra.mxu1 %v2125_v16  ;;  %1976 = vmatprep.subr.bf16.mxu0 %v2126_v19 }
  0x5d   : > { %1996 = vmatprep.subr.bf16.mxu1 %v2127_v20 }
  0x5f   : > { %1977 = vmatpush3.bf16.msra.mxu0 %v2126_v19 }
  0x60   : > { %1997 = vmatpush3.bf16.msra.mxu1 %v2127_v20  ;;  %1978 = vmatprep.subr.bf16.mxu0 %v2128_v23 }
  0x61   : > { %1998 = vmatprep.subr.bf16.mxu1 %v2129_v24 }
  0x63   : > { %1979 = vmatpush3.bf16.msra.mxu0 %v2128_v23 }
  0x64   : > { %1999 = vmatpush3.bf16.msra.mxu1 %v2129_v24  ;;  %2004 = vmatprep.subr.bf16.mxu0 %v2132_v33 }
  0x65   : > { %2024 = vmatprep.subr.bf16.mxu1 %v2135_v34 }
  0x66   : > { %1981 = vmatmul.mubr.bf16.vlgmr.msra.gmra.mrb[8].mxu0 %v2330_v6 }
  0x67   : > { %2005 = vmatpush3.bf16.msra.mxu0 %v2132_v33  ;;  %2001 = vmatmul.mubr.bf16.vlgmr.msra.gmra.mrb[8].mxu1 %v2134_v37 }
  0x68   : > { %2025 = vmatpush3.bf16.msra.mxu1 %v2135_v34  ;;  %2006 = vmatprep.subr.bf16.mxu0 %v2136_v40 }
  0x69   : > { %2026 = vmatprep.subr.bf16.mxu1 %v2137_v41  ;;  %2020 = vmatprep.mubr.bf16.mxu0 %v1063_v42 }
  0x6a   : > { %2040 = vmatprep.mubr.bf16.mxu1 %v1219_v43 }
  0x6b   : > { %2007 = vmatpush3.bf16.msra.mxu0 %v2136_v40 }
  0x6c   : > { %2027 = vmatpush3.bf16.msra.mxu1 %v2137_v41  ;;  %2008 = vmatprep.subr.bf16.mxu0 %v2138_v44 }
  0x6d   : > { %2028 = vmatprep.subr.bf16.mxu1 %v2139_v45 }
  0x6f   : > { %2009 = vmatpush3.bf16.msra.mxu0 %v2138_v44 }
  0x70   : > { %2029 = vmatpush3.bf16.msra.mxu1 %v2139_v45  ;;  %2010 = vmatprep.subr.bf16.mxu0 %v2140_v46 }
  0x71   : > { %2030 = vmatprep.subr.bf16.mxu1 %v2141_v47 }
  0x73   : > { %2011 = vmatpush3.bf16.msra.mxu0 %v2140_v46 }
  0x74   : > { %2031 = vmatpush3.bf16.msra.mxu1 %v2141_v47  ;;  %2012 = vmatprep.subr.bf16.mxu0 %v2142_v48 }
  0x75   : > { %2032 = vmatprep.subr.bf16.mxu1 %v2143_v49 }
  0x77   : > { %2013 = vmatpush3.bf16.msra.mxu0 %v2142_v48 }
  0x78   : > { %2033 = vmatpush3.bf16.msra.mxu1 %v2143_v49  ;;  %2014 = vmatprep.subr.bf16.mxu0 %v2144_v50 }
  0x79   : > { %2034 = vmatprep.subr.bf16.mxu1 %v2145_v51 }
  0x7b   : > { %2015 = vmatpush3.bf16.msra.mxu0 %v2144_v50 }
  0x7c   : > { %2035 = vmatpush3.bf16.msra.mxu1 %v2145_v51  ;;  %2016 = vmatprep.subr.bf16.mxu0 %v2146_v52 }
  0x7d   : > { %2036 = vmatprep.subr.bf16.mxu1 %v2147_v53 }
  0x7f   : > { %2017 = vmatpush3.bf16.msra.mxu0 %v2146_v52 }
  0x80   : > { %2037 = vmatpush3.bf16.msra.mxu1 %v2147_v53  ;;  %2018 = vmatprep.subr.bf16.mxu0 %v2148_v54 }
  0x81   : > { %2038 = vmatprep.subr.bf16.mxu1 %v2149_v55 }
  0x83   : > { %2019 = vmatpush3.bf16.msra.mxu0 %v2148_v54 }
  0x84   : > { %2039 = vmatpush3.bf16.msra.mxu1 %v2149_v55  ;;  %2044 = vmatprep.subr.bf16.mxu0 %v2152_v58 }
  0x86   : > { %2021 = vmatmul.mubr.bf16.vlgmr.msra.gmra.mrb[12].mxu0 %v1062_v36 }
  0x87   : > { %2045 = vmatpush3.bf16.msra.mxu0 %v2152_v58  ;;  %2041 = vmatmul.mubr.bf16.vlgmr.msra.gmra.mrb[12].mxu1 %v2384_v39 }
  0x88   : > { %2046 = vmatprep.subr.bf16.mxu0 %v2155_v61  ;;  %2060 = vmatprep.mubr.bf16.mxu0 %v1360_v62 }
  0x8b   : > { %2047 = vmatpush3.bf16.msra.mxu0 %v2155_v61 }
  0x8c   : > { %2048 = vmatprep.subr.bf16.mxu0 %v2156_v63 }
  0x8f   : > { %2049 = vmatpush3.bf16.msra.mxu0 %v2156_v63 }
  0x90   : > { %2050 = vmatprep.subr.bf16.mxu0 %v2157_v0 }
  0x93   : > { %2051 = vmatpush3.bf16.msra.mxu0 %v2157_v0 }
  0x94   : > { %2052 = vmatprep.subr.bf16.mxu0 %v2158_v1 }
  0x97   : > { %2053 = vmatpush3.bf16.msra.mxu0 %v2158_v1 }
  0x98   : > { %2054 = vmatprep.subr.bf16.mxu0 %v2159_v2 }
  0x9b   : > { %2055 = vmatpush3.bf16.msra.mxu0 %v2159_v2 }
  0x9c   : > { %2056 = vmatprep.subr.bf16.mxu0 %v2160_v3 }
  0x9f   : > { %2057 = vmatpush3.bf16.msra.mxu0 %v2160_v3 }
  0xa0   : > { %2058 = vmatprep.subr.bf16.mxu0 %v2161_v4 }
  0xa3   : > { %2059 = vmatpush3.bf16.msra.mxu0 %v2161_v4 }
  0xa6   : > { %2061 = vmatmul.mubr.bf16.vlgmr.msra.gmra.mrb[16].mxu0 %v1359_v60 }
  0xf9   : > { %v1902_v5 = vpop.f32.mrb[0].mxu0 }
  0xfa   : > { %v1922_v6 = vpop.f32.mrb[0].mxu1  ;;  %v283_v7 = vpop.f32.mrb[1].mxu0 }
  0xfb   : > { %v450_v8 = vadd.f32 %v1922_v6, %v1902_v5  ;;  %v431_v9 = vpop.f32.mrb[1].mxu1  ;;  %v1903_v10 = vpop.f32.mrb[2].mxu0 }
  0xfc   : > { %v448_v11 = vadd.f32 %v431_v9, %v283_v7  ;;  %v1923_v12 = vpop.f32.mrb[2].mxu1  ;;  %v286_v13 = vpop.f32.mrb[3].mxu0 }
  0xfd   : > { %v434_v14 = vpop.f32.mrb[3].mxu1 }
  0xfe   : > { %v449_v15 = vadd.f32 %v434_v14, %v286_v13 }
 0x119   : > { %v1942_v16 = vpop.f32.mrb[4].mxu0 }
 0x11a   : > { %v592_v17 = vadd.f32 %v1942_v16, %v450_v8  ;;  %v573_v18 = vpop.f32.mrb[5].mxu0  ;;  %v1962_v19 = vpop.f32.mrb[4].mxu1 }
 0x11b   : > { %v590_v20 = vadd.f32 %v573_v18, %v448_v11  ;;  %v1943_v21 = vpop.f32.mrb[6].mxu0  ;;  %v715_v22 = vpop.f32.mrb[5].mxu1 }
 0x11c   : > { %v734_v23 = vadd.f32 %v1962_v19, %v592_v17  ;;  %v576_v24 = vpop.f32.mrb[7].mxu0  ;;  %v1963_v25 = vpop.f32.mrb[6].mxu1 }
 0x11d   : > { %v591_v26 = vadd.f32 %v576_v24, %v449_v15  ;;  %v732_v27 = vadd.f32 %v715_v22, %v590_v20  ;;  %v718_v28 = vpop.f32.mrb[7].mxu1 }
 0x11f   : > { %v733_v29 = vadd.f32 %v718_v28, %v591_v26 }
 0x139   : > { %v1982_v30 = vpop.f32.mrb[8].mxu0 }
 0x13a   : > { %v890_v31 = vadd.f32 %v1982_v30, %v734_v23  ;;  %v871_v32 = vpop.f32.mrb[9].mxu0  ;;  %v2002_v33 = vpop.f32.mrb[8].mxu1 }
 0x13b   : > { %v888_v34 = vadd.f32 %v871_v32, %v732_v27  ;;  %v1983_v35 = vpop.f32.mrb[10].mxu0  ;;  %v1006_v36 = vpop.f32.mrb[9].mxu1 }
 0x13c   : > { %v1025_v37 = vadd.f32 %v2002_v33, %v890_v31  ;;  %v874_v38 = vpop.f32.mrb[11].mxu0  ;;  %v2003_v39 = vpop.f32.mrb[10].mxu1 }
 0x13d   : > { %v889_v40 = vadd.f32 %v874_v38, %v733_v29  ;;  %v1023_v41 = vadd.f32 %v1006_v36, %v888_v34  ;;  %v1009_v42 = vpop.f32.mrb[11].mxu1 }
 0x13f   : > { %v1024_v43 = vadd.f32 %v1009_v42, %v889_v40 }
 0x159   : > { %v2022_v44 = vpop.f32.mrb[12].mxu0 }
 0x15a   : > { %v1167_v45 = vadd.f32 %v2022_v44, %v1025_v37  ;;  %v1148_v46 = vpop.f32.mrb[13].mxu0  ;;  %v2042_v47 = vpop.f32.mrb[12].mxu1 }
 0x15b   : > { %v1165_v48 = vadd.f32 %v1148_v46, %v1023_v41  ;;  %v2023_v49 = vpop.f32.mrb[14].mxu0  ;;  %v1304_v50 = vpop.f32.mrb[13].mxu1 }
 0x15c   : > { %v1323_v51 = vadd.f32 %v2042_v47, %v1167_v45  ;;  %v1151_v52 = vpop.f32.mrb[15].mxu0  ;;  %v2043_v53 = vpop.f32.mrb[14].mxu1 }
 0x15d   : > { %v1166_v54 = vadd.f32 %v1151_v52, %v1024_v43  ;;  %v1321_v55 = vadd.f32 %v1304_v50, %v1165_v48  ;;  %v1307_v56 = vpop.f32.mrb[15].mxu1 }
 0x15f   : > { %v1322_v57 = vadd.f32 %v1307_v56, %v1166_v54 }
 0x179   : > { %v2062_v58 = vpop.f32.mrb[16].mxu0 }
 0x17a   : > { %v1464_v60 = vadd.f32 %v2062_v58, %v1323_v51  ;;  %v1445_v61 = vpop.f32.mrb[17].mxu0 }
 0x17b   : > { %v1462_v62 = vadd.f32 %v1445_v61, %v1321_v55  ;;  %v2063_v63 = vpop.f32.mrb[18].mxu0 }
 0x17c   : > { %v1480_v0 = vadd.f32 %v1780_v59, %v1464_v60  ;;  %v1448_v1 = vpop.f32.mrb[19].mxu0 }
 0x17d   : > { %v1478_v2 = vadd.f32 %v1780_v59, %v1462_v62  ;;  %v1463_v3 = vadd.f32 %v1448_v1, %v1322_v57 }
 0x17e   : > { %v1483_v4 = vmax.f32 %v1480_v0, 0.0 }
 0x17f   : > { %v1479_v5 = vadd.f32 %v1780_v59, %v1463_v3  ;;  %v1481_v7 = vmax.f32 %v1478_v2, 0.0 }
 0x180   : > { %v1788_v6 = vpack.c.bf16 %v1483_v4, %v1483_v4 }
 0x181   : > { %v1482_v8 = vmax.f32 %v1479_v5, 0.0 }
 0x182   : > { %1499 = vst [vmem:[%s170_s21 + $0x8] sm:$0xf] %v1788_v6 }
 0x183   : > { %v1792_v9 = vpack.c.bf16 %v1482_v8, %v1481_v7 }
 0x185   : > { %1793 = vst [vmem:[%s170_s21] sm:$0xff] %v1792_v9  }
 0x186 PF: > { %s13_s12 = sadd.s32 1, %s2170_s12  }
 0x187   : > { %p10_p4 = scmp.ge.s32.totalorder %s13_s12, 4  }
 0x189   :  { %12 = sbr.rel (!%p10_p4) target bundleno = 1 (0x1), region = 70 }

// kernel: petals_to_metals_forward.9
= control target key start
LH: loop header
LB: loop body
LE: loop exit
PB: predicated region body
PF: predicated region fallthrough
CT: control target
= control target key end

     0   :  { %v277_v3 = vmov 0.0|0.0   ;;  %v278_v6 = vmov 0.0   ;;  %vm279_vm0 = vmmov 0   ;;  %s378_s0 = inlined_call_operand.vmem [shape: bf16[2,16,128], index: 0, kind: input, shape index: {}]   ;;  %s379_s1 = inlined_call_operand.vmem [shape: f32[128,128], index: 1, kind: input, shape index: {}]   ;;  %s380_s2 = inlined_call_operand.vmem [shape: f32[1,128], index: 2, kind: input, shape index: {}]   ;;  %s381_s3 = inlined_call_operand.hbm [shape: f32[2,128], index: 3, kind: output, shape index: {}]  }
   0x1   :  { %v55_v0 = vld [vmem:[%s379_s1] sm:$0xff]  ;;  %v56_v1 = vld [vmem:[%s379_s1 + $0x8] sm:$0xff]  ;;  %v57_v2 = vld [vmem:[%s379_s1 + $0x10] sm:$0xff]  ;;  %225 = vmatprep.subr.bf16.mxu0 %v277_v3  ;;  %19 = vst [vmem:[#allocation2] sm:$0x3] %v278_v6  ;;  %222 = vmatprep.mubr.msk.f32.mxu0 %vm279_vm0, %v278_v6 }
   0x2   :  { %v226_v4 = vpack.c.bf16 %v56_v1, %v55_v0  ;;  %v58_v5 = vld [vmem:[%s379_s1 + $0x18] sm:$0xff]  ;;  %v59_v8 = vld [vmem:[%s379_s1 + $0x20] sm:$0xff]  ;;  %v60_v9 = vld [vmem:[%s379_s1 + $0x28] sm:$0xff] }
   0x3   :  { %v229_v7 = vpack.c.bf16 %v58_v5, %v57_v2  ;;  %v165_v10 = vld [vmem:[%s378_s0] sm:$0xff]   ;;  %v172_v11 = vld [vmem:[%s378_s0 + $0x8] sm:$0xff]  }
   0x4   :  { %227 = vmatpush3.bf16.msra.mxu0 %v226_v4  ;;  %v166_v12 = vunpack.c.l.bf16 %v165_v10  ;;  %v167_v13 = vunpack.c.h.bf16 %v165_v10  ;;  %v170_v14 = vunpack.c.l.bf16 %v172_v11 }
   0x5   :  { %228 = vmatprep.subr.bf16.mxu0 %v277_v3 }
   0x6   :  { %8 = vsyncpa [#allocation4], 0  ;;  %v232_v15 = vpack.c.bf16 %v60_v9, %v59_v8  ;;  %v171_v16 = vunpack.c.h.bf16 %v172_v11  ;;  %v61_v17 = vld [vmem:[%s379_s1 + $0x30] sm:$0xff]  ;;  %v62_v18 = vld [vmem:[%s379_s1 + $0x38] sm:$0xff]  ;;  %v29_v19 = vadd.f32 %v167_v13, %v166_v12  ;;  %vm45_vm1 = vcmask 1041409   ;;  %s280_s22 = smov [#allocation3]  }
   0x7   :  { %v235_v22 = vpack.c.bf16 %v62_v18, %v61_v17  ;;  %v63_v24 = vld [vmem:[%s379_s1 + $0x40] sm:$0xff]  ;;  %v64_v25 = vld [vmem:[%s379_s1 + $0x48] sm:$0xff]  ;;  %v65_v31 = vld [vmem:[%s379_s1 + $0x50] sm:$0xff]  ;;  %s155_s23 = sshll.u32 %s280_s22, 4  ;;  %s156_s23 = int_to_ptr.vmem [resolvable:$true] %s155_s23 }
   0x8   :  { %230 = vmatpush3.bf16.msra.mxu0 %v229_v7  ;;  %v36_v20 = vadd.f32 %v171_v16, %v170_v14  ;;  %v30_v21 = vrot.slane %v29_v19, 4  ;;  %v238_v29 = vpack.c.bf16 %v64_v25, %v63_v24  ;;  %v66_v32 = vld [vmem:[%s379_s1 + $0x58] sm:$0xff]  ;;  %v67_v38 = vld [vmem:[%s379_s1 + $0x60] sm:$0xff]  ;;  %v68_v39 = vld [vmem:[%s379_s1 + $0x68] sm:$0xff]  ;;  %p258_p1 = scmp.lt.s32.totalorder %s156_s23, %s156_s23 }
   0x9   :  { %231 = vmatprep.subr.bf16.mxu0 %v277_v3  ;;  %v241_v36 = vpack.c.bf16 %v66_v32, %v65_v31  ;;  %v20_v41 = vld [vmem:[#allocation2] sm:$0x3]  ;;  %v244_v43 = vpack.c.bf16 %v68_v39, %v67_v38  ;;  %v69_v45 = vld [vmem:[%s379_s1 + $0x70] sm:$0xff]  ;;  %v70_v46 = vld [vmem:[%s379_s1 + $0x78] sm:$0xff]  ;;  %s253_s1 = scalar_lea.vmem %s156_s23, 32 }
   0xa   :  { %v37_v23 = vrot.slane %v36_v20, 4  ;;  %v31_v26 = vadd.f32 %v30_v21, %v29_v19  ;;  %v247_v48 = vpack.c.bf16 %v70_v46, %v69_v45  ;;  %v163_v51 = vld [vmem:[%s380_s2] ss:$0 sm:$0xff]  ;;  %p254_p0 = scmp.ne.s32.totalorder %s156_s23, %s253_s1  ;;  %p259_p2 = scmp.lt.s32.totalorder %s253_s1, %s253_s1 }
   0xc   :  { %233 = vmatpush3.bf16.msra.mxu0 %v232_v15  ;;  %v38_v27 = vadd.f32 %v37_v23, %v36_v20  ;;  %v32_v28 = vrot.slane %v31_v26, 2  ;;  %p260_p3 = por %p259_p2, %p258_p1 }
   0xd   :  { %234 = vmatprep.subr.bf16.mxu0 %v277_v3 }
   0xe   :  { %v39_v30 = vrot.slane %v38_v27, 2  ;;  %v33_v33 = vadd.f32 %v32_v28, %v31_v26  ;;  %p261_p4 = pnand %p260_p3, %p254_p0 }
  0x10   :  { %236 = vmatpush3.bf16.msra.mxu0 %v235_v22  ;;  %v40_v34 = vadd.f32 %v39_v30, %v38_v27  ;;  %v34_v35 = vrot.slane %v33_v33, 1 }
  0x11   :  { %237 = vmatprep.subr.bf16.mxu0 %v277_v3 }
  0x12   :  { %v41_v37 = vrot.slane %v40_v34, 1  ;;  %v35_v40 = vadd.f32 %v34_v35, %v33_v33 }
  0x14   :  { %239 = vmatpush3.bf16.msra.mxu0 %v238_v29  ;;  %v42_v42 = vadd.f32 %v41_v37, %v40_v34 }
  0x15   :  { %240 = vmatprep.subr.bf16.mxu0 %v277_v3 }
  0x16   :  { %v46_v44 = vsel %vm45_vm1, %v42_v42, %v35_v40 }
  0x17   :  { %v48_v47 = vadd.f32 %v46_v44, %v20_v41 }
  0x18   :  { %242 = vmatpush3.bf16.msra.mxu0 %v241_v36 }
  0x19   :  { %243 = vmatprep.subr.bf16.mxu0 %v277_v3  ;;  %49 = vst [vmem:[#allocation2] sm:$0x3] %v48_v47 }
  0x1c   :  { %245 = vmatpush3.bf16.msra.mxu0 %v244_v43 }
  0x1d   :  { %246 = vmatprep.subr.bf16.mxu0 %v277_v3 }
  0x20   :  { %248 = vmatpush3.bf16.msra.mxu0 %v247_v48  ;;  %v53_v49 = vld [vmem:[#allocation2] sm:$0x3] }
  0x21   :  { %v54_v50 = vmul.f32 0.0625, %v53_v49 }
  0x23   :  { %223 = vmatmul.mubr.f32.vlgmr.msra.gmra.mrb[0].mxu0 %v54_v50 }
  0xf6   :  { %v144_v52 = vpop.f32.mrb[0].mxu0 }
  0xf7   :  { %v145_v53 = vadd.f32 %v163_v51, %v144_v52  ;;  %v224_v54 = vpop.f32.mrb[1].mxu0 }
  0xf9   :  { %148 = vst [vmem:[#allocation3] sm:$0x3] %v145_v53 }
  0xfa   :  { %264 = shalt.err (!%p261_p4)
}
  0xfb   :  { %s265_s26 = scalar_lea.hbm %s381_s3, 32 }
  0xfc   :  { %p266_p5 = scmp.ne.s32.totalorder %s381_s3, %s265_s26  ;;  %p269_p6 = scmp.lt.u32.totalorder %s265_s26, %s381_s3 }
  0xfe   :  { %p271_p7 = pnand %p269_p6, %p266_p5 }
 0x100   :  { %274 = shalt.err (!%p271_p7)
}
 0x101   :  { %158 = dma.vmem_to_hbm [thread:$0]  %s156_s23, 32, %s381_s3, [#allocation4]  }
 0x102   :  { %275 = dma.done.wait [#allocation4], 32  }
 0x103   :  { %276 = vsyncadd [#allocation4], 4294967264 }
 0x104   :  { %162 = vsyncpa [#allocation4], 1 }

// kernel: petals_to_metals_forward.8
= control target key start
LH: loop header
LB: loop body
LE: loop exit
PB: predicated region body
PF: predicated region fallthrough
CT: control target
= control target key end

     0   :  { %s2270_s15 = smov 0   ;;  %s2553_s0 = inlined_call_operand.vmem [shape: bf16[2,40,128], index: 0, kind: input, shape index: {}]   ;;  %s2554_s1 = inlined_call_operand.vmem [shape: bf16[9,128,128], index: 1, kind: input, shape index: {}]   ;;  %s2555_s2 = inlined_call_operand.vmem [shape: f32[1,128], index: 2, kind: input, shape index: {}]   ;;  %s2556_s3 = inlined_call_operand.vmem [shape: bf16[2,24,128], index: 3, kind: input, shape index: {}]   ;;  %s2557_s4 = inlined_call_operand.vmem [shape: bf16[2,24,128], index: 4, kind: output, shape index: {}]  }
   0x1 LB: > { %s1623_s16 = sadd.s32 4294967295, %s2243_s15   ;;  %p1627_p0 = scmp.ge.s32.totalorder %s2243_s15, 1  ;;  %s2243_s15 = sphi %s2270_s15, %s14_s15  }
   0x2   : > { %p172_p1 = scmp.lt.s32.totalorder %s2243_s15, 3 }
   0x4   : > { %p173_p2 = pnand %p1627_p0, %p172_p1 }
   0x5   : > { %v2147_v0 = vld [vmem:[%s2554_s1] sm:$0xff] (!%p173_p2)   ;;  %v2149_v2 = vld [vmem:[%s2554_s1 + $0x8] sm:$0xff] (!%p173_p2)   ;;  %p203_p3 = scmp.lt.s32.totalorder (!%p173_p2), %s1623_s16, 1  ;;  %v2151_v4 = vld [vmem:[%s2554_s1 + $0x10] sm:$0xff] (!%p173_p2)   ;;  %vm378_vm0 = vsmask.f32 (!%p173_p2), 7424 }
   0x6   : > { %176 = sbr.rel (%p173_p2) target bundleno = 392 (0x188), region = 36  ;;  %v2148_v1 = vld [vmem:[%s2554_s1 + $0x40] sm:$0xff] (!%p173_p2)   ;;  %1957 = vmatprep.subr.bf16.mxu0 (!%p173_p2), %v2147_v0  ;;  %v2150_v3 = vld [vmem:[%s2554_s1 + $0x48] sm:$0xff] (!%p173_p2)   ;;  %v2152_v5 = vld [vmem:[%s2554_s1 + $0x50] sm:$0xff] (!%p173_p2)   ;;  %vm532_vm1 = vcmask (!%p173_p2), 1046528   ;;  %vm674_vm2 = vcmask (!%p173_p2), 1044480  }
   0x7   : > { %1977 = vmatprep.subr.bf16.mxu1 (!%p173_p2), %v2148_v1  ;;  %1958 = vmatpush3.bf16.msra.mxu0 (!%p173_p2), %v2147_v0  ;;  %v2153_v6 = vld [vmem:[%s2554_s1 + $0x18] sm:$0xff] (!%p173_p2)   ;;  %v2155_v8 = vld [vmem:[%s2554_s1 + $0x20] sm:$0xff] (!%p173_p2)   ;;  %v2157_v10 = vld [vmem:[%s2554_s1 + $0x28] sm:$0xff] (!%p173_p2)   ;;  %vm816_vm3 = vsmask.f32 (!%p173_p2), 4352  ;;  %vm1107_vm4 = vcmask (!%p173_p2), 1045504  }
   0x8   : > { %1978 = vmatpush3.bf16.msra.mxu1 (!%p173_p2), %v2148_v1  ;;  %1959 = vmatprep.subr.bf16.mxu0 (!%p173_p2), %v2149_v2  ;;  %v2154_v7 = vld [vmem:[%s2554_s1 + $0x58] sm:$0xff] (!%p173_p2)   ;;  %v2156_v9 = vld [vmem:[%s2554_s1 + $0x60] sm:$0xff] (!%p173_p2)   ;;  %v2158_v11 = vld [vmem:[%s2554_s1 + $0x68] sm:$0xff] (!%p173_p2)   ;;  %vm1249_vm5 = vsmask.f32 (!%p173_p2), 5376 }
   0x9   : > { %1979 = vmatprep.subr.bf16.mxu1 (!%p173_p2), %v2150_v3  ;;  %v2159_v15 = vld [vmem:[%s2554_s1 + $0x30] sm:$0xff] (!%p173_p2)   ;;  %v2161_v22 = vld [vmem:[%s2554_s1 + $0x38] sm:$0xff] (!%p173_p2)   ;;  %v2167_v27 = vld [vmem:[%s2554_s1 + $0x80] sm:$0xff] (!%p173_p2)  }
   0xa   : > { %v2160_v19 = vld [vmem:[%s2554_s1 + $0x70] sm:$0xff] (!%p173_p2)   ;;  %v2162_v24 = vld [vmem:[%s2554_s1 + $0x78] sm:$0xff] (!%p173_p2)   ;;  %v2168_v28 = vld [vmem:[%s2554_s1 + $0xc0] sm:$0xff] (!%p173_p2)  }
   0xb   : > { %1960 = vmatpush3.bf16.msra.mxu0 (!%p173_p2), %v2149_v2  ;;  %v2169_v31 = vld [vmem:[%s2554_s1 + $0x88] sm:$0xff] (!%p173_p2)   ;;  %v2171_v33 = vld [vmem:[%s2554_s1 + $0x90] sm:$0xff] (!%p173_p2)   ;;  %v2173_v35 = vld [vmem:[%s2554_s1 + $0x98] sm:$0xff] (!%p173_p2)  }
   0xc   : > { %1980 = vmatpush3.bf16.msra.mxu1 (!%p173_p2), %v2150_v3  ;;  %1961 = vmatprep.subr.bf16.mxu0 (!%p173_p2), %v2151_v4  ;;  %v2170_v32 = vld [vmem:[%s2554_s1 + $0xc8] sm:$0xff] (!%p173_p2)   ;;  %v2172_v34 = vld [vmem:[%s2554_s1 + $0xd0] sm:$0xff] (!%p173_p2)   ;;  %v2174_v38 = vld [vmem:[%s2554_s1 + $0xd8] sm:$0xff] (!%p173_p2)  }
   0xd   : > { %s2559_s16 = smov (!%p203_p3, %s1623_s16), 1  ;;  %1981 = vmatprep.subr.bf16.mxu1 %v2152_v5  ;;  %v2175_v46 = vld [vmem:[%s2554_s1 + $0xa0] sm:$0xff]   ;;  %v2177_v49 = vld [vmem:[%s2554_s1 + $0xa8] sm:$0xff]   ;;  %v2179_v51 = vld [vmem:[%s2554_s1 + $0xb0] sm:$0xff]  }
   0xe   : > { %s2137_s7 = smul.u32 20, %s2559_s16  ;;  %v2176_v47 = vld [vmem:[%s2554_s1 + $0xe0] sm:$0xff]   ;;  %v2178_v50 = vld [vmem:[%s2554_s1 + $0xe8] sm:$0xff]   ;;  %v2180_v52 = vld [vmem:[%s2554_s1 + $0xf0] sm:$0xff]  }
   0xf   : > { %1962 = vmatpush3.bf16.msra.mxu0 %v2151_v4  ;;  %v2181_v53 = vld [vmem:[%s2554_s1 + $0xb8] sm:$0xff]   ;;  %v2185_v56 = vld [vmem:[%s2554_s1 + $0x100] sm:$0xff]   ;;  %v2189_v63 = vld [vmem:[%s2554_s1 + $0x108] sm:$0xff]   ;;  %s2138_s25 = smul.u32 12, %s2559_s16 }
  0x10   : > { %1982 = vmatpush3.bf16.msra.mxu1 %v2152_v5  ;;  %1963 = vmatprep.subr.bf16.mxu0 %v2153_v6  ;;  %s2320_s20 = scalar_lea.vmem %s2553_s0, %s2137_s7  ;;  %v2182_v54 = vld [vmem:[%s2554_s1 + $0xf8] sm:$0xff]   ;;  %v2188_v60 = vld [vmem:[%s2554_s1 + $0x140] sm:$0xff]   ;;  %v2190_v5 = vld [vmem:[%s2554_s1 + $0x148] sm:$0xff]  }
  0x11   : > { %1983 = vmatprep.subr.bf16.mxu1 %v2154_v7  ;;  %v2163_v12 = vld [vmem:[%s2320_s20] sm:$0xff]   ;;  %v2165_v14 = vld [vmem:[%s2320_s20 + $0x8] sm:$0x1f]   ;;  %s212_s28 = scalar_lea.vmem %s2556_s3, %s2138_s25  ;;  %s217_s6 = scalar_lea.vmem %s2557_s4, %s2138_s25 }
  0x12   : > { %1973 = vmatprep.mubr.bf16.mxu0 %v2163_v12  ;;  %v2164_v13 = vld [vmem:[%s2320_s20] sm:$0xff]   ;;  %v387_v18 = vshll.u32 %v2165_v14, 16  ;;  %v391_v26 = vshrl.u32 %v2165_v14, 16  ;;  %v2166_v29 = vld [vmem:[%s2320_s20 + $0x8] ss:$0 sps:$4 sm:$0xff]   ;;  %v2194_v12 = vld [vmem:[%s2554_s1 + $0x158] sm:$0xff]  }
  0x13   : > { %1964 = vmatpush3.bf16.msra.mxu0 %v2153_v6  ;;  %v380_v16 = vshrl.u32 %v2164_v13, 16  ;;  %v382_v17 = vshll.u32 %v2164_v13, 16  ;;  %v2183_v36 = vld [vmem:[%s2320_s20] sm:$0xfe]   ;;  %v2361_v37 = vld [vmem:[%s2320_s20 + $0x8] sm:$0x1f]  }
  0x14   : > { %1984 = vmatpush3.bf16.msra.mxu1 %v2154_v7  ;;  %1965 = vmatprep.subr.bf16.mxu0 %v2155_v8  ;;  %v389_v21 = vrot.slane %v387_v18, 1  ;;  %v533_v39 = vrot.slane %v2183_v36, 1  ;;  %v534_v40 = vrot.slane %v2361_v37, 1  ;;  %v2186_v41 = vld [vmem:[%s2320_s20] sm:$0xf8]   ;;  %v2204_v57 = vld [vmem:[%s2320_s20 + $0x8] sm:$0xff]  }
  0x15   : > { %1985 = vmatprep.subr.bf16.mxu1 %v2156_v9  ;;  %v384_v20 = vrot.slane %v382_v17, 1  ;;  %v2187_v42 = vld [vmem:[%s2320_s20 + $0x8] sm:$0x7f]   ;;  %v675_v44 = vrot.slane %v2186_v41, 3  ;;  %v2203_v55 = vld [vmem:[%s2320_s20] sm:$0xf8]  }
  0x16   : > { %v393_v30 = vor.u32 %v391_v26, %v389_v21  ;;  %v535_v43 = vsel %vm532_vm1, %v533_v39, %v534_v40  ;;  %v676_v45 = vrot.slane %v2187_v42, 3  ;;  %v818_v58 = vshrl.u32 %v2203_v55, 16  ;;  %v2206_v7 = vld [vmem:[%s2320_s20 + $0x4] sm:$0xff]   ;;  %v2227_v18 = vld [vmem:[%s2320_s20 + $0xc] sm:$0x7f]  }
  0x17   : > { %1966 = vmatpush3.bf16.msra.mxu0 %v2155_v8  ;;  %v385_v23 = vor.u32 %v384_v20, %v380_v16  ;;  %v821_v59 = vshll.u32 %v2203_v55, 16  ;;  %v826_v61 = vshrl.u32 %v2204_v57, 16  ;;  %v829_v62 = vshll.u32 %v2204_v57, 16  ;;  %v2195_v13 = vld [vmem:[%s2554_s1 + $0x120] sm:$0xff]   ;;  %v2198_v16 = vld [vmem:[%s2554_s1 + $0x168] sm:$0xff]   ;;  %v2200_v20 = vld [vmem:[%s2554_s1 + $0x170] sm:$0xff]  }
  0x18   : > { %1986 = vmatpush3.bf16.msra.mxu1 %v2156_v9  ;;  %1967 = vmatprep.subr.bf16.mxu0 %v2157_v10  ;;  %v677_v48 = vsel %vm674_vm2, %v675_v44, %v676_v45  ;;  %v820_v0 = vrot.slane %v818_v58, 3  ;;  %v2191_v9 = vld [vmem:[%s2554_s1 + $0x110] sm:$0xff]   ;;  %v2196_v14 = vld [vmem:[%s2554_s1 + $0x160] sm:$0xff]   ;;  %v1262_v26 = vshll.u32 %v2227_v18, 16  ;;  %v2207_v37 = vld [vmem:[%s2320_s20 + $0xc] ss:$0 sps:$4 sm:$0xff]  }
  0x19   : > { %1987 = vmatprep.subr.bf16.mxu1 %v2158_v11  ;;  %v390_v25 = vsel %vm378_vm0, %v385_v23, %v389_v21  ;;  %v823_v1 = vrot.slane %v821_v59, 4  ;;  %v828_v2 = vrot.slane %v826_v61, 3  ;;  %v831_v3 = vrot.slane %v829_v62, 4  ;;  %v2226_v17 = vld [vmem:[%s2320_s20 + $0x4] sm:$0xfc]   ;;  %v2201_v23 = vld [vmem:[%s2554_s1 + $0x138] sm:$0xff]  }
  0x1a   : > { %1993 = vmatprep.mubr.bf16.mxu1 %v390_v25  ;;  %v1251_v21 = vshrl.u32 %v2226_v17, 16  ;;  %v1259_v25 = vshrl.u32 %v2227_v18, 16  ;;  %v2210_v41 = vld [vmem:[%s2554_s1 + $0x1c8] sm:$0xff]   ;;  %v2211_v44 = vld [vmem:[%s2554_s1 + $0x190] sm:$0xff]   ;;  %v2222_v55 = vld [vmem:[%s2554_s1 + $0x1f8] sm:$0xff]  }
  0x1b   : > { %1968 = vmatpush3.bf16.msra.mxu0 %v2157_v10  ;;  %v824_v4 = vor.u32 %v823_v1, %v820_v0  ;;  %v2408_v6 = vor.u32 %v831_v3, %v828_v2  ;;  %v2192_v10 = vld [vmem:[%s2554_s1 + $0x150] sm:$0xff]   ;;  %v2225_v58 = vld [vmem:[%s2554_s1 + $0x200] sm:$0xff]   ;;  %v2228_v61 = vld [vmem:[%s2554_s1 + $0x208] sm:$0xff]  }
  0x1c   : > { %1988 = vmatpush3.bf16.msra.mxu1 %v2158_v11  ;;  %1969 = vmatprep.subr.bf16.mxu0 %v2159_v15  ;;  %v2193_v11 = vld [vmem:[%s2554_s1 + $0x118] sm:$0xff]   ;;  %v2236_v57 = vld [vmem:[%s2320_s20 + $0xc] sm:$0x7f]   ;;  %v2231_v1 = vld [vmem:[%s2554_s1 + $0x220] sm:$0xff]  }
  0x1d   : > { %1989 = vmatprep.subr.bf16.mxu1 %v2160_v19  ;;  %v833_v8 = vsel %vm816_vm3, %v824_v4, %v2408_v6  ;;  %v2230_v0 = vld [vmem:[%s2554_s1 + $0x218] sm:$0xff]   ;;  %v2232_v2 = vld [vmem:[%s2554_s1 + $0x228] sm:$0xff]   ;;  %v2233_v3 = vld [vmem:[%s2554_s1 + $0x230] sm:$0xff]  }
  0x1e   : > { %v2234_v4 = vld [vmem:[%s2554_s1 + $0x238] sm:$0xff]  }
  0x1f   : > { %1970 = vmatpush3.bf16.msra.mxu0 %v2159_v15  ;;  %v2197_v15 = vld [vmem:[%s2554_s1 + $0x128] sm:$0xff]  }
  0x20   : > { %1990 = vmatpush3.bf16.msra.mxu1 %v2160_v19  ;;  %1971 = vmatprep.subr.bf16.mxu0 %v2161_v22  ;;  %v2199_v19 = vld [vmem:[%s2554_s1 + $0x130] sm:$0xff]  }
  0x21   : > { %1991 = vmatprep.subr.bf16.mxu1 %v2162_v24 }
  0x23   : > { %1972 = vmatpush3.bf16.msra.mxu0 %v2161_v22  ;;  %v1254_v22 = vshll.u32 %v2226_v17, 16 }
  0x24   : > { %1992 = vmatpush3.bf16.msra.mxu1 %v2162_v24  ;;  %1997 = vmatprep.subr.bf16.mxu0 %v2167_v27  ;;  %v2202_v24 = vld [vmem:[%s2554_s1 + $0x178] sm:$0xff]  }
  0x25   : > { %2017 = vmatprep.subr.bf16.mxu1 %v2168_v28 }
  0x26   : > { %1974 = vmatmul.mubr.bf16.vlgmr.msra.gmra.mrb[0].mxu0 %v2166_v29  ;;  %v1253_v29 = vrot.slane %v1251_v21, 2 }
  0x27   : > { %1994 = vmatmul.mubr.bf16.vlgmr.msra.gmra.mrb[0].mxu1 %v393_v30  ;;  %1998 = vmatpush3.bf16.msra.mxu0 %v2167_v27  ;;  %v2223_v27 = vld [vmem:[%s2320_s20 + $0x4] sm:$0xfc]   ;;  %v1256_v30 = vrot.slane %v1254_v22, 3 }
  0x28   : > { %2018 = vmatpush3.bf16.msra.mxu1 %v2168_v28  ;;  %1999 = vmatprep.subr.bf16.mxu0 %v2169_v31  ;;  %v2452_v28 = vld [vmem:[%s2320_s20 + $0xc] sm:$0x3f]  }
  0x29   : > { %2019 = vmatprep.subr.bf16.mxu1 %v2170_v32  ;;  %2013 = vmatprep.mubr.bf16.mxu0 %v535_v43  ;;  %v1109_v36 = vrot.slane %v2452_v28, 2 }
  0x2a   : > { %2033 = vmatprep.mubr.bf16.mxu1 %v677_v48  ;;  %v2215_v48 = vld [vmem:[%s2554_s1 + $0x1a0] sm:$0xff]  }
  0x2b   : > { %2000 = vmatpush3.bf16.msra.mxu0 %v2169_v31  ;;  %v1261_v31 = vrot.slane %v1259_v25, 2 }
  0x2c   : > { %2020 = vmatpush3.bf16.msra.mxu1 %v2170_v32  ;;  %2001 = vmatprep.subr.bf16.mxu0 %v2171_v33  ;;  %v1264_v32 = vrot.slane %v1262_v26, 3 }
  0x2d   : > { %2021 = vmatprep.subr.bf16.mxu1 %v2172_v34 }
  0x2e   : > { %v2462_v39 = vor.u32 %v1264_v32, %v1261_v31 }
  0x2f   : > { %2002 = vmatpush3.bf16.msra.mxu0 %v2171_v33  ;;  %v2205_v33 = vld [vmem:[%s2554_s1 + $0x180] sm:$0xff]  }
  0x30   : > { %2022 = vmatpush3.bf16.msra.mxu1 %v2172_v34  ;;  %2003 = vmatprep.subr.bf16.mxu0 %v2173_v35  ;;  %v2208_v34 = vld [vmem:[%s2554_s1 + $0x1c0] sm:$0xff]  }
  0x31   : > { %2023 = vmatprep.subr.bf16.mxu1 %v2174_v38 }
  0x33   : > { %2004 = vmatpush3.bf16.msra.mxu0 %v2173_v35  ;;  %v1108_v35 = vrot.slane %v2223_v27, 2 }
  0x34   : > { %2024 = vmatpush3.bf16.msra.mxu1 %v2174_v38  ;;  %2005 = vmatprep.subr.bf16.mxu0 %v2175_v46  ;;  %v1257_v38 = vor.u32 %v1256_v30, %v1253_v29 }
  0x35   : > { %2025 = vmatprep.subr.bf16.mxu1 %v2176_v47  ;;  %v1110_v42 = vsel %vm1107_vm4, %v1108_v35, %v1109_v36 }
  0x36   : > { %v1266_v43 = vsel %vm1249_vm5, %v1257_v38, %v2462_v39 }
  0x37   : > { %2006 = vmatpush3.bf16.msra.mxu0 %v2175_v46  ;;  %v2213_v46 = vld [vmem:[%s2554_s1 + $0x198] sm:$0xff]  }
  0x38   : > { %2026 = vmatpush3.bf16.msra.mxu1 %v2176_v47  ;;  %2007 = vmatprep.subr.bf16.mxu0 %v2177_v49  ;;  %v2214_v47 = vld [vmem:[%s2554_s1 + $0x1d8] sm:$0xff]  }
  0x39   : > { %2027 = vmatprep.subr.bf16.mxu1 %v2178_v50 }
  0x3b   : > { %2008 = vmatpush3.bf16.msra.mxu0 %v2177_v49  ;;  %v2216_v49 = vld [vmem:[%s2554_s1 + $0x1e0] sm:$0xff]  }
  0x3c   : > { %2028 = vmatpush3.bf16.msra.mxu1 %v2178_v50  ;;  %2009 = vmatprep.subr.bf16.mxu0 %v2179_v51  ;;  %v2217_v50 = vld [vmem:[%s2554_s1 + $0x1a8] sm:$0xff]  }
  0x3d   : > { %2029 = vmatprep.subr.bf16.mxu1 %v2180_v52 }
  0x3f   : > { %2010 = vmatpush3.bf16.msra.mxu0 %v2179_v51  ;;  %v2218_v51 = vld [vmem:[%s2554_s1 + $0x1e8] sm:$0xff]  }
  0x40   : > { %2030 = vmatpush3.bf16.msra.mxu1 %v2180_v52  ;;  %2011 = vmatprep.subr.bf16.mxu0 %v2181_v53  ;;  %v2219_v52 = vld [vmem:[%s2554_s1 + $0x1b0] sm:$0xff]  }
  0x41   : > { %2031 = vmatprep.subr.bf16.mxu1 %v2182_v54 }
  0x43   : > { %2012 = vmatpush3.bf16.msra.mxu0 %v2181_v53  ;;  %v2220_v53 = vld [vmem:[%s2554_s1 + $0x1f0] sm:$0xff]  }
  0x44   : > { %2032 = vmatpush3.bf16.msra.mxu1 %v2182_v54  ;;  %2037 = vmatprep.subr.bf16.mxu0 %v2185_v56  ;;  %v2221_v54 = vld [vmem:[%s2554_s1 + $0x1b8] sm:$0xff]  }
  0x45   : > { %2057 = vmatprep.subr.bf16.mxu1 %v2188_v60 }
  0x46   : > { %2014 = vmatmul.mubr.bf16.vlgmr.msra.gmra.mrb[4].mxu0 %v534_v40  ;;  %v2209_v40 = vld [vmem:[%s2554_s1 + $0x188] sm:$0xff]  }
  0x47   : > { %2038 = vmatpush3.bf16.msra.mxu0 %v2185_v56  ;;  %2034 = vmatmul.mubr.bf16.vlgmr.msra.gmra.mrb[4].mxu1 %v676_v45  ;;  %v2212_v45 = vld [vmem:[%s2554_s1 + $0x1d0] sm:$0xff]   ;;  %v2235_v56 = vld [vmem:[%s2320_s20 + $0x4] sm:$0xf8]  }
  0x48   : > { %2058 = vmatpush3.bf16.msra.mxu1 %v2188_v60  ;;  %2039 = vmatprep.subr.bf16.mxu0 %v2189_v63  ;;  %v1405_v59 = vrot.slane %v2235_v56, 3  ;;  %v1406_v60 = vrot.slane %v2236_v57, 3 }
  0x49   : > { %2059 = vmatprep.subr.bf16.mxu1 %v2190_v5  ;;  %2053 = vmatprep.mubr.bf16.mxu0 %v833_v8 }
  0x4a   : > { %2073 = vmatprep.mubr.bf16.mxu1 %v2206_v7  ;;  %v1407_v62 = vsel %vm674_vm2, %v1405_v59, %v1406_v60  ;;  %v1849_v59 = vld [vmem:[%s2555_s2] ss:$0 sm:$0xff] }
  0x4b   : > { %2040 = vmatpush3.bf16.msra.mxu0 %v2189_v63  ;;  %v2229_v63 = vld [vmem:[%s2554_s1 + $0x210] sm:$0xff]  }
  0x4c   : > { %2060 = vmatpush3.bf16.msra.mxu1 %v2190_v5  ;;  %2041 = vmatprep.subr.bf16.mxu0 %v2191_v9 }
  0x4d   : > { %2061 = vmatprep.subr.bf16.mxu1 %v2192_v10 }
  0x4f   : > { %2042 = vmatpush3.bf16.msra.mxu0 %v2191_v9 }
  0x50   : > { %2062 = vmatpush3.bf16.msra.mxu1 %v2192_v10  ;;  %2043 = vmatprep.subr.bf16.mxu0 %v2193_v11 }
  0x51   : > { %2063 = vmatprep.subr.bf16.mxu1 %v2194_v12 }
  0x53   : > { %2044 = vmatpush3.bf16.msra.mxu0 %v2193_v11 }
  0x54   : > { %2064 = vmatpush3.bf16.msra.mxu1 %v2194_v12  ;;  %2045 = vmatprep.subr.bf16.mxu0 %v2195_v13 }
  0x55   : > { %2065 = vmatprep.subr.bf16.mxu1 %v2196_v14 }
  0x57   : > { %2046 = vmatpush3.bf16.msra.mxu0 %v2195_v13 }
  0x58   : > { %2066 = vmatpush3.bf16.msra.mxu1 %v2196_v14  ;;  %2047 = vmatprep.subr.bf16.mxu0 %v2197_v15 }
  0x59   : > { %2067 = vmatprep.subr.bf16.mxu1 %v2198_v16 }
  0x5b   : > { %2048 = vmatpush3.bf16.msra.mxu0 %v2197_v15 }
  0x5c   : > { %2068 = vmatpush3.bf16.msra.mxu1 %v2198_v16  ;;  %2049 = vmatprep.subr.bf16.mxu0 %v2199_v19 }
  0x5d   : > { %2069 = vmatprep.subr.bf16.mxu1 %v2200_v20 }
  0x5f   : > { %2050 = vmatpush3.bf16.msra.mxu0 %v2199_v19 }
  0x60   : > { %2070 = vmatpush3.bf16.msra.mxu1 %v2200_v20  ;;  %2051 = vmatprep.subr.bf16.mxu0 %v2201_v23 }
  0x61   : > { %2071 = vmatprep.subr.bf16.mxu1 %v2202_v24 }
  0x63   : > { %2052 = vmatpush3.bf16.msra.mxu0 %v2201_v23 }
  0x64   : > { %2072 = vmatpush3.bf16.msra.mxu1 %v2202_v24  ;;  %2077 = vmatprep.subr.bf16.mxu0 %v2205_v33 }
  0x65   : > { %2097 = vmatprep.subr.bf16.mxu1 %v2208_v34 }
  0x66   : > { %2054 = vmatmul.mubr.bf16.vlgmr.msra.gmra.mrb[8].mxu0 %v2408_v6 }
  0x67   : > { %2078 = vmatpush3.bf16.msra.mxu0 %v2205_v33  ;;  %2074 = vmatmul.mubr.bf16.vlgmr.msra.gmra.mrb[8].mxu1 %v2207_v37 }
  0x68   : > { %2098 = vmatpush3.bf16.msra.mxu1 %v2208_v34  ;;  %2079 = vmatprep.subr.bf16.mxu0 %v2209_v40 }
  0x69   : > { %2099 = vmatprep.subr.bf16.mxu1 %v2210_v41  ;;  %2093 = vmatprep.mubr.bf16.mxu0 %v1110_v42 }
  0x6a   : > { %2113 = vmatprep.mubr.bf16.mxu1 %v1266_v43 }
  0x6b   : > { %2080 = vmatpush3.bf16.msra.mxu0 %v2209_v40 }
  0x6c   : > { %2100 = vmatpush3.bf16.msra.mxu1 %v2210_v41  ;;  %2081 = vmatprep.subr.bf16.mxu0 %v2211_v44 }
  0x6d   : > { %2101 = vmatprep.subr.bf16.mxu1 %v2212_v45 }
  0x6f   : > { %2082 = vmatpush3.bf16.msra.mxu0 %v2211_v44 }
  0x70   : > { %2102 = vmatpush3.bf16.msra.mxu1 %v2212_v45  ;;  %2083 = vmatprep.subr.bf16.mxu0 %v2213_v46 }
  0x71   : > { %2103 = vmatprep.subr.bf16.mxu1 %v2214_v47 }
  0x73   : > { %2084 = vmatpush3.bf16.msra.mxu0 %v2213_v46 }
  0x74   : > { %2104 = vmatpush3.bf16.msra.mxu1 %v2214_v47  ;;  %2085 = vmatprep.subr.bf16.mxu0 %v2215_v48 }
  0x75   : > { %2105 = vmatprep.subr.bf16.mxu1 %v2216_v49 }
  0x77   : > { %2086 = vmatpush3.bf16.msra.mxu0 %v2215_v48 }
  0x78   : > { %2106 = vmatpush3.bf16.msra.mxu1 %v2216_v49  ;;  %2087 = vmatprep.subr.bf16.mxu0 %v2217_v50 }
  0x79   : > { %2107 = vmatprep.subr.bf16.mxu1 %v2218_v51 }
  0x7b   : > { %2088 = vmatpush3.bf16.msra.mxu0 %v2217_v50 }
  0x7c   : > { %2108 = vmatpush3.bf16.msra.mxu1 %v2218_v51  ;;  %2089 = vmatprep.subr.bf16.mxu0 %v2219_v52 }
  0x7d   : > { %2109 = vmatprep.subr.bf16.mxu1 %v2220_v53 }
  0x7f   : > { %2090 = vmatpush3.bf16.msra.mxu0 %v2219_v52 }
  0x80   : > { %2110 = vmatpush3.bf16.msra.mxu1 %v2220_v53  ;;  %2091 = vmatprep.subr.bf16.mxu0 %v2221_v54 }
  0x81   : > { %2111 = vmatprep.subr.bf16.mxu1 %v2222_v55 }
  0x83   : > { %2092 = vmatpush3.bf16.msra.mxu0 %v2221_v54 }
  0x84   : > { %2112 = vmatpush3.bf16.msra.mxu1 %v2222_v55  ;;  %2117 = vmatprep.subr.bf16.mxu0 %v2225_v58 }
  0x86   : > { %2094 = vmatmul.mubr.bf16.vlgmr.msra.gmra.mrb[12].mxu0 %v1109_v36 }
  0x87   : > { %2118 = vmatpush3.bf16.msra.mxu0 %v2225_v58  ;;  %2114 = vmatmul.mubr.bf16.vlgmr.msra.gmra.mrb[12].mxu1 %v2462_v39 }
  0x88   : > { %2119 = vmatprep.subr.bf16.mxu0 %v2228_v61  ;;  %2133 = vmatprep.mubr.bf16.mxu0 %v1407_v62 }
  0x8b   : > { %2120 = vmatpush3.bf16.msra.mxu0 %v2228_v61 }
  0x8c   : > { %2121 = vmatprep.subr.bf16.mxu0 %v2229_v63 }
  0x8f   : > { %2122 = vmatpush3.bf16.msra.mxu0 %v2229_v63 }
  0x90   : > { %2123 = vmatprep.subr.bf16.mxu0 %v2230_v0 }
  0x93   : > { %2124 = vmatpush3.bf16.msra.mxu0 %v2230_v0 }
  0x94   : > { %2125 = vmatprep.subr.bf16.mxu0 %v2231_v1 }
  0x97   : > { %2126 = vmatpush3.bf16.msra.mxu0 %v2231_v1 }
  0x98   : > { %2127 = vmatprep.subr.bf16.mxu0 %v2232_v2 }
  0x9b   : > { %2128 = vmatpush3.bf16.msra.mxu0 %v2232_v2 }
  0x9c   : > { %2129 = vmatprep.subr.bf16.mxu0 %v2233_v3 }
  0x9f   : > { %2130 = vmatpush3.bf16.msra.mxu0 %v2233_v3  ;;  %v1859_v3 = vld [vmem:[%s212_s28] sm:$0xff]  }
  0xa0   : > { %2131 = vmatprep.subr.bf16.mxu0 %v2234_v4 }
  0xa3   : > { %2132 = vmatpush3.bf16.msra.mxu0 %v2234_v4 }
  0xa6   : > { %2134 = vmatmul.mubr.bf16.vlgmr.msra.gmra.mrb[16].mxu0 %v1406_v60  ;;  %v1533_v60 = vld [vmem:[%s212_s28 + $0x8] sm:$0xf] }
  0xa7   : > { %v1536_v2 = vunpack.c.l.bf16 %v1533_v60 }
  0xf9   : > { %v1975_v5 = vpop.f32.mrb[0].mxu0 }
  0xfa   : > { %v1995_v6 = vpop.f32.mrb[0].mxu1  ;;  %v330_v7 = vpop.f32.mrb[1].mxu0 }
  0xfb   : > { %v497_v8 = vadd.f32 %v1995_v6, %v1975_v5  ;;  %v478_v9 = vpop.f32.mrb[1].mxu1  ;;  %v1976_v10 = vpop.f32.mrb[2].mxu0 }
  0xfc   : > { %v495_v11 = vadd.f32 %v478_v9, %v330_v7  ;;  %v1996_v12 = vpop.f32.mrb[2].mxu1  ;;  %v333_v13 = vpop.f32.mrb[3].mxu0  ;;  %v1860_v9 = vunpack.c.l.bf16 %v1859_v3 }
  0xfd   : > { %v481_v14 = vpop.f32.mrb[3].mxu1 }
  0xfe   : > { %v496_v15 = vadd.f32 %v481_v14, %v333_v13 }
 0x119   : > { %v2015_v16 = vpop.f32.mrb[4].mxu0 }
 0x11a   : > { %v639_v17 = vadd.f32 %v2015_v16, %v497_v8  ;;  %v620_v18 = vpop.f32.mrb[5].mxu0  ;;  %v2035_v19 = vpop.f32.mrb[4].mxu1 }
 0x11b   : > { %v637_v20 = vadd.f32 %v620_v18, %v495_v11  ;;  %v2016_v21 = vpop.f32.mrb[6].mxu0  ;;  %v762_v22 = vpop.f32.mrb[5].mxu1  ;;  %v1861_v11 = vunpack.c.h.bf16 %v1859_v3 }
 0x11c   : > { %v781_v23 = vadd.f32 %v2035_v19, %v639_v17  ;;  %v623_v24 = vpop.f32.mrb[7].mxu0  ;;  %v2036_v25 = vpop.f32.mrb[6].mxu1 }
 0x11d   : > { %v638_v26 = vadd.f32 %v623_v24, %v496_v15  ;;  %v779_v27 = vadd.f32 %v762_v22, %v637_v20  ;;  %v765_v28 = vpop.f32.mrb[7].mxu1 }
 0x11f   : > { %v780_v29 = vadd.f32 %v765_v28, %v638_v26 }
 0x139   : > { %v2055_v30 = vpop.f32.mrb[8].mxu0 }
 0x13a   : > { %v937_v31 = vadd.f32 %v2055_v30, %v781_v23  ;;  %v918_v32 = vpop.f32.mrb[9].mxu0  ;;  %v2075_v33 = vpop.f32.mrb[8].mxu1 }
 0x13b   : > { %v935_v34 = vadd.f32 %v918_v32, %v779_v27  ;;  %v2056_v35 = vpop.f32.mrb[10].mxu0  ;;  %v1053_v36 = vpop.f32.mrb[9].mxu1 }
 0x13c   : > { %v1072_v37 = vadd.f32 %v2075_v33, %v937_v31  ;;  %v921_v38 = vpop.f32.mrb[11].mxu0  ;;  %v2076_v39 = vpop.f32.mrb[10].mxu1 }
 0x13d   : > { %v936_v40 = vadd.f32 %v921_v38, %v780_v29  ;;  %v1070_v41 = vadd.f32 %v1053_v36, %v935_v34  ;;  %v1056_v42 = vpop.f32.mrb[11].mxu1 }
 0x13f   : > { %v1071_v43 = vadd.f32 %v1056_v42, %v936_v40 }
 0x159   : > { %v2095_v44 = vpop.f32.mrb[12].mxu0 }
 0x15a   : > { %v1214_v45 = vadd.f32 %v2095_v44, %v1072_v37  ;;  %v1195_v46 = vpop.f32.mrb[13].mxu0  ;;  %v2115_v47 = vpop.f32.mrb[12].mxu1 }
 0x15b   : > { %v1212_v48 = vadd.f32 %v1195_v46, %v1070_v41  ;;  %v2096_v49 = vpop.f32.mrb[14].mxu0  ;;  %v1351_v50 = vpop.f32.mrb[13].mxu1 }
 0x15c   : > { %v1370_v51 = vadd.f32 %v2115_v47, %v1214_v45  ;;  %v1198_v52 = vpop.f32.mrb[15].mxu0  ;;  %v2116_v53 = vpop.f32.mrb[14].mxu1 }
 0x15d   : > { %v1213_v54 = vadd.f32 %v1198_v52, %v1071_v43  ;;  %v1368_v55 = vadd.f32 %v1351_v50, %v1212_v48  ;;  %v1354_v56 = vpop.f32.mrb[15].mxu1 }
 0x15f   : > { %v1369_v57 = vadd.f32 %v1354_v56, %v1213_v54 }
 0x179   : > { %v2135_v58 = vpop.f32.mrb[16].mxu0 }
 0x17a   : > { %v1511_v61 = vadd.f32 %v2135_v58, %v1370_v51  ;;  %v1492_v62 = vpop.f32.mrb[17].mxu0 }
 0x17b   : > { %v1509_v63 = vadd.f32 %v1492_v62, %v1368_v55  ;;  %v2136_v0 = vpop.f32.mrb[18].mxu0 }
 0x17c   : > { %v1527_v1 = vadd.f32 %v1849_v59, %v1511_v61  ;;  %v1495_v4 = vpop.f32.mrb[19].mxu0 }
 0x17d   : > { %v1525_v5 = vadd.f32 %v1849_v59, %v1509_v63  ;;  %v1510_v6 = vadd.f32 %v1495_v4, %v1369_v57 }
 0x17e   : > { %v1530_v7 = vmax.f32 %v1527_v1, 0.0 }
 0x17f   : > { %v1528_v8 = vmax.f32 %v1525_v5, 0.0  ;;  %v1526_v10 = vadd.f32 %v1849_v59, %v1510_v6 }
 0x180   : > { %v1539_v12 = vadd.f32 %v1536_v2, %v1530_v7 }
 0x181   : > { %v1529_v13 = vmax.f32 %v1526_v10, 0.0  ;;  %v1537_v15 = vadd.f32 %v1860_v9, %v1528_v8 }
 0x182   : > { %v1857_v14 = vpack.c.bf16 %v1539_v12, %v1539_v12 }
 0x183   : > { %v1538_v16 = vadd.f32 %v1861_v11, %v1529_v13 }
 0x184   : > { %1555 = vst [vmem:[%s217_s6 + $0x8] sm:$0xf] %v1857_v14 }
 0x185   : > { %v1865_v17 = vpack.c.bf16 %v1538_v16, %v1537_v15 }
 0x187   : > { %1866 = vst [vmem:[%s217_s6] sm:$0xff] %v1865_v17  }
 0x188 PF: > { %s14_s15 = sadd.s32 1, %s2243_s15  }
 0x189   : > { %p11_p4 = scmp.ge.s32.totalorder %s14_s15, 4  }
 0x18b   :  { %13 = sbr.rel (!%p11_p4) target bundleno = 1 (0x1), region = 77 }

</bundles_post_ra>
